<compile_context>
chip_gen: v7x
topology: tpu7x:2x2x1
jax: 0.10.0
libtpu: 0.0.40
codegen_flags: <defaults>
</compile_context>

<pallas_src>
import jax
import jax.numpy as jnp
from jax.experimental import pallas as pl
from jax.experimental.pallas import tpu as pltpu


def _bottleneck_kernel(x_ref, w1_ref, b1_ref, w2_ref, b2_ref, w3_ref, b3_ref,
                       o_ref):
    # x_ref : (1, H, W, Cin) bf16  full image for the current batch element
    #         (same block for every row tile of that element -> DMA'd once).
    # o_ref : (1, TH, W, Cout) bf16 current output row tile.
    _, H, W, Cin = x_ref.shape
    _, TH, _, Cout = o_ref.shape
    C = w1_ref.shape[1]

    r = pl.program_id(1)
    row0 = pl.multiple_of(r * TH, TH)

    # ------------------------------------------------------------ conv1 (1x1)
    # Three bf16 MXU matmuls (top halo row, TH middle rows, bottom halo row);
    # only the C-wide outputs are stitched -- the 4C-wide input is never copied.
    top = jnp.maximum(row0 - 1, 0)           # clamped halo reads
    bot = jnp.minimum(row0 + TH, H - 1)
    x_top = x_ref[0, pl.ds(top, 1)]          # (1,  W, Cin) bf16
    x_mid = x_ref[0, pl.ds(row0, TH)]        # (TH, W, Cin) bf16
    x_bot = x_ref[0, pl.ds(bot, 1)]          # (1,  W, Cin) bf16

    w1 = w1_ref[...]
    b1 = b1_ref[...]

    def conv1(xrows, m):                     # (m, W, Cin) -> (m*W, C) f32
        acc = jnp.dot(xrows.reshape(m * W, Cin), w1,
                      preferred_element_type=jnp.float32)
        return jnp.maximum(acc + b1, 0.0)    # BN scale pre-folded into w1

    o1_mid = conv1(x_mid, TH)
    # Halo rows outside the image must read as zero (3x3 SAME zero padding);
    # this is a scalar predicate per halo row -- no per-element //W or %W.
    o1_top = jnp.where(row0 > 0, conv1(x_top, 1), 0.0)
    o1_bot = jnp.where(row0 + TH < H, conv1(x_bot, 1), 0.0)

    o1 = jnp.concatenate(
        [o1_top.astype(jnp.bfloat16).reshape(1, W, C),
         o1_mid.astype(jnp.bfloat16).reshape(TH, W, C),
         o1_bot.astype(jnp.bfloat16).reshape(1, W, C)],
        axis=0)                              # (TH+2, W, C) bf16

    # --------------------------------------------- conv2 (3x3, stride=1, pad=1)
    # kw taps are width-shifted bf16 copies with an explicit zero column (no
    # cross-row wrap, no column mask); the nine (kh, kw) taps are concatenated
    # along channels so the whole 3x3 conv is ONE MXU matmul with a 9C
    # contraction and the accumulation stays inside the MXU result path.
    zcol = jnp.zeros((TH + 2, 1, C), jnp.bfloat16)
    left = jnp.concatenate([zcol, o1[:, :W - 1, :]], axis=1)   # value at w-1
    right = jnp.concatenate([o1[:, 1:, :], zcol], axis=1)      # value at w+1

    tap9 = jnp.concatenate(
        [left[0:TH],     o1[0:TH],     right[0:TH],        # kh = 0
         left[1:TH + 1], o1[1:TH + 1], right[1:TH + 1],    # kh = 1
         left[2:TH + 2], o1[2:TH + 2], right[2:TH + 2]],   # kh = 2
        axis=2)                              # (TH, W, 9C) bf16

    o2 = jnp.dot(tap9.reshape(TH * W, 9 * C), w2_ref[...],
                 preferred_element_type=jnp.float32)        # (TH*W, C) f32
    o2 = jnp.maximum(o2 + b2_ref[...], 0.0)

    # -------------------------------------------- conv3 (1x1) + residual + relu
    o3 = jnp.dot(o2.astype(jnp.bfloat16), w3_ref[...],
                 preferred_element_type=jnp.float32)        # (TH*W, Cout) f32
    o3 = o3 + b3_ref[...]
    res = x_mid.reshape(TH * W, Cin).astype(jnp.float32)    # Cin == Cout
    o3 = jnp.maximum(o3 + res, 0.0)
    o_ref[...] = o3.reshape(1, TH, W, Cout).astype(o_ref.dtype)


def _device_budget():
    """(vmem_limit_bytes, row_tile_cap) per TPU generation."""
    try:
        kind = jax.devices()[0].device_kind.lower()
    except Exception:
        kind = ""
    if "v5" in kind or "v6" in kind:
        # 128 MiB-class VMEM: spend more on the tile -> fewer grid steps,
        # bigger MXU M dim, less halo recompute.
        return 64 * 1024 * 1024, 64
    # v7x (64 MiB physical VMEM) and unknown chips: conservative budget.
    return 32 * 1024 * 1024, 32


def _pick_row_tile(h, cap):
    # Largest divisor of h that fits the cap.  NOTE: a prime h > cap degrades
    # to TH=1 (correct, but ~3x conv1 halo recompute) -- pad h in that case.
    best = 1
    for t in range(1, min(h, cap) + 1):
        if h % t == 0:
            best = t
    return best


def _fold_params(params):
    """Fold eval-mode BN scales into the conv weights (f32), then cast bf16."""
    (w1, s1, b1, w2, s2, b2, w3, s3, b3) = params
    Cin, C = w1.shape
    Cout = w3.shape[1]
    w1f = (w1 * s1).astype(jnp.bfloat16)                        # (Cin, C)
    w2f = (w2 * s2).astype(jnp.bfloat16).reshape(9 * C, C)      # (kh,kw,ci)-major
    w3f = (w3 * s3).astype(jnp.bfloat16)                        # (C, 4C)
    return (w1f, b1.reshape(1, C).astype(jnp.float32),
            w2f, b2.reshape(1, C).astype(jnp.float32),
            w3f, b3.reshape(1, Cout).astype(jnp.float32))


def bottleneck_pallas_nhwc(x_nhwc, params, *, row_tile=None):
    """x_nhwc: (N, H, W, Cin), any float dtype. Returns (N, H, W, 4C) bf16."""
    (w1, _, _, _, _, _, w3, _, _) = params
    N, H, W, Cin = x_nhwc.shape
    Cin_w, C = w1.shape
    Cout = w3.shape[1]
    assert Cin == Cin_w and Cin == Cout == 4 * C, \
        "identity residual requires in_channel == out_channel*4"

    vmem_limit, cap = _device_budget()
    TH = _pick_row_tile(H, cap) if row_tile is None else row_tile
    assert H % TH == 0, f"row_tile {TH} must divide H={H}"
    R = H // TH

    x = x_nhwc.astype(jnp.bfloat16)          # bf16 activations at the boundary
    w1f, b1f, w2f, b2f, w3f, b3f = _fold_params(params)

    def full_spec(a):
        zeros = (0,) * a.ndim
        return pl.BlockSpec(a.shape, lambda n, r, _z=zeros: _z)

    return pl.pallas_call(
        _bottleneck_kernel,
        out_shape=jax.ShapeDtypeStruct((N, H, W, Cout), jnp.bfloat16),
        grid_spec=pltpu.PrefetchScalarGridSpec(
            num_scalar_prefetch=0,
            grid=(N, R),
            in_specs=[
                # Full image per batch element; block index does not change with
                # r, so it stays VMEM-resident across the row tiles of one n.
                pl.BlockSpec((1, H, W, Cin), lambda n, r: (n, 0, 0, 0)),
                full_spec(w1f), full_spec(b1f),
                full_spec(w2f), full_spec(b2f),
                full_spec(w3f), full_spec(b3f),
            ],
            out_specs=pl.BlockSpec((1, TH, W, Cout), lambda n, r: (n, r, 0, 0)),
        ),
        compiler_params=pltpu.CompilerParams(
            dimension_semantics=("parallel", "parallel"),
            vmem_limit_bytes=vmem_limit),
    )(x, w1f, b1f, w2f, b2f, w3f, b3f)


def bottleneck_pallas(x_nchw, params, *, row_tile=None):
    """NCHW f32 adapter matching the PyTorch module's layout contract.

    NOTE: the two transposes are HBM-bound XLA ops kept only for PyTorch layout
    parity; an NHWC/bf16 pipeline should call bottleneck_pallas_nhwc directly.
    """
    x = jnp.transpose(x_nchw.astype(jnp.bfloat16), (0, 2, 3, 1))
    out = bottleneck_pallas_nhwc(x, params, row_tile=row_tile)
    return jnp.transpose(out, (0, 3, 1, 2)).astype(jnp.float32)


def make_params(key, in_channel, out_channel):
    """Deterministic synthetic weights / eval-mode BN stats (module shapes)."""
    C, Cin, Cout = out_channel, in_channel, 4 * out_channel
    ks = jax.random.split(key, 15)
    eps = 1e-5

    def bn(kg, kb, km, kv, c):
        gamma = 1.0 + 0.1 * jax.random.normal(kg, (c,), jnp.float32)
        beta = 0.1 * jax.random.normal(kb, (c,), jnp.float32)
        mean = 0.1 * jax.random.normal(km, (c,), jnp.float32)
        var = jnp.abs(jax.random.normal(kv, (c,), jnp.float32)) + 0.5
        scale = gamma / jnp.sqrt(var + eps)
        bias = beta - mean * scale
        return scale, bias

    # Conv weights kept in f32 (module parameters); BN scale is folded and the
    # result cast to bf16 in _fold_params (fold in f32 -> no extra quant error).
    #   w1: (Cin, C) [1x1]    w2: (3, 3, C, C) [HWIO]    w3: (C, 4C) [1x1]
    w1 = 0.1 * jax.random.normal(ks[0], (Cin, C), jnp.float32)
    w2 = 0.1 * jax.random.normal(ks[1], (3, 3, C, C), jnp.float32)
    w3 = 0.1 * jax.random.normal(ks[2], (C, Cout), jnp.float32)
    s1, b1 = bn(ks[3], ks[4], ks[5], ks[6], C)
    s2, b2 = bn(ks[7], ks[8], ks[9], ks[10], C)
    s3, b3 = bn(ks[11], ks[12], ks[13], ks[14], Cout)
    return (w1, s1, b1, w2, s2, b2, w3, s3, b3)


def bottleneck_reference(x_nchw, params):
    """Pure-JAX reference (lax.conv, bf16 operands / f32 accumulation,
    BN folded to scale/bias -- same numerics policy as the kernel)."""
    (w1, s1, b1, w2, s2, b2, w3, s3, b3) = params
    Cin, C = w1.shape
    Cout = w3.shape[1]
    x = jnp.transpose(x_nchw, (0, 2, 3, 1)).astype(jnp.bfloat16)
    dn = ('NHWC', 'HWIO', 'NHWC')

    def conv(a, w_hwio, pad):
        return jax.lax.conv_general_dilated(
            a, w_hwio, (1, 1), pad, dimension_numbers=dn,
            preferred_element_type=jnp.float32)

    w1f = (w1 * s1).astype(jnp.bfloat16).reshape(1, 1, Cin, C)
    w2f = (w2 * s2).astype(jnp.bfloat16)
    w3f = (w3 * s3).astype(jnp.bfloat16).reshape(1, 1, C, Cout)

    o = jnp.maximum(conv(x, w1f, 'VALID') + b1, 0.0)
    o = jnp.maximum(conv(o.astype(jnp.bfloat16), w2f, 'SAME') + b2, 0.0)
    o = conv(o.astype(jnp.bfloat16), w3f, 'VALID') + b3
    o = jnp.maximum(o + x.astype(jnp.float32), 0.0)
    return jnp.transpose(o, (0, 3, 1, 2))


if __name__ == "__main__":
    key = jax.random.PRNGKey(0)
    k_x, k_p = jax.random.split(key)

    out_channel = 4
    in_channel = out_channel * 4        # identity residual path (downsample=None)
    N, H, W = 2, 16, 16

    x = jax.random.normal(k_x, (N, in_channel, H, W), jnp.float32)
    params = make_params(k_p, in_channel, out_channel)

    ref = bottleneck_reference(x, params)

    # row_tile=8 exercises the multi-tile halo path; row_tile=16 the single-tile path.
    for row_tile in (8, 16):
        out = jax.block_until_ready(bottleneck_pallas(x, params, row_tile=row_tile))
        assert out.shape == (N, 4 * out_channel, H, W)
        err = float(jnp.max(jnp.abs(out - ref)))
        assert jnp.allclose(out, ref, atol=2e-2, rtol=2e-2), \
            f"row_tile={row_tile}: max err {err}"

    print("KERNEL_OK")
</pallas_src>

<mosaic_0001>
module attributes {stable_mosaic.version = 11 : i64} {
  func.func @_bottleneck_kernel(%arg0: i32, %arg1: i32, %arg2: memref<1x16x16x16xbf16, #tpu.memory_space<vmem>>, %arg3: memref<16x4xbf16, #tpu.memory_space<vmem>>, %arg4: memref<1x4xf32, #tpu.memory_space<vmem>>, %arg5: memref<36x4xbf16, #tpu.memory_space<vmem>>, %arg6: memref<1x4xf32, #tpu.memory_space<vmem>>, %arg7: memref<4x16xbf16, #tpu.memory_space<vmem>>, %arg8: memref<1x16xf32, #tpu.memory_space<vmem>>, %arg9: memref<1x8x16x16xbf16, #tpu.memory_space<vmem>>) attributes {dimension_semantics = [#tpu.dimension_semantics<parallel>, #tpu.dimension_semantics<parallel>], iteration_bounds = array<i64: 2, 2>, scalar_prefetch = 0 : i64, scratch_operands = 0 : i64, tpu.core_type = #tpu.core_type<tc>, window_params = [{transform_indices = @transform_0, window_bounds = array<i64: 1, 16, 16, 16>}, {pipeline_mode = #tpu.pipeline_mode<synchronous>, transform_indices = @transform_1, window_bounds = array<i64: 16, 4>}, {pipeline_mode = #tpu.pipeline_mode<synchronous>, transform_indices = @transform_2, window_bounds = array<i64: 1, 4>}, {pipeline_mode = #tpu.pipeline_mode<synchronous>, transform_indices = @transform_3, window_bounds = array<i64: 36, 4>}, {pipeline_mode = #tpu.pipeline_mode<synchronous>, transform_indices = @transform_4, window_bounds = array<i64: 1, 4>}, {pipeline_mode = #tpu.pipeline_mode<synchronous>, transform_indices = @transform_5, window_bounds = array<i64: 4, 16>}, {pipeline_mode = #tpu.pipeline_mode<synchronous>, transform_indices = @transform_6, window_bounds = array<i64: 1, 16>}, {transform_indices = @transform_7, window_bounds = array<i64: 1, 8, 16, 16>}]} {
    %c8_i32 = arith.constant 8 : i32
    %0 = arith.muli %arg1, %c8_i32 : i32
    %1 = tpu.assume_multiple %0, 8 : i32
    %c1_i32 = arith.constant 1 : i32
    %2 = arith.subi %1, %c1_i32 : i32
    %c0_i32 = arith.constant 0 : i32
    %3 = arith.maxsi %2, %c0_i32 : i32
    %c8_i32_0 = arith.constant 8 : i32
    %4 = arith.addi %1, %c8_i32_0 : i32
    %c15_i32 = arith.constant 15 : i32
    %5 = arith.minsi %4, %c15_i32 : i32
    %c0 = arith.constant 0 : index
    %6 = arith.index_cast %3 : i32 to index
    %c0_1 = arith.constant 0 : index
    %c0_2 = arith.constant 0 : index
    %7 = vector.load %arg2[%c0, %6, %c0_1, %c0_2] : memref<1x16x16x16xbf16, #tpu.memory_space<vmem>>, vector<1x1x16x16xbf16>
    %8 = vector.shape_cast %7 : vector<1x1x16x16xbf16> to vector<1x16x16xbf16>
    %c0_3 = arith.constant 0 : index
    %9 = arith.index_cast %1 : i32 to index
    %c0_4 = arith.constant 0 : index
    %c0_5 = arith.constant 0 : index
    %10 = vector.load %arg2[%c0_3, %9, %c0_4, %c0_5] : memref<1x16x16x16xbf16, #tpu.memory_space<vmem>>, vector<1x8x16x16xbf16>
    %11 = vector.shape_cast %10 : vector<1x8x16x16xbf16> to vector<8x16x16xbf16>
    %c0_6 = arith.constant 0 : index
    %12 = arith.index_cast %5 : i32 to index
    %c0_7 = arith.constant 0 : index
    %c0_8 = arith.constant 0 : index
    %13 = vector.load %arg2[%c0_6, %12, %c0_7, %c0_8] : memref<1x16x16x16xbf16, #tpu.memory_space<vmem>>, vector<1x1x16x16xbf16>
    %14 = vector.shape_cast %13 : vector<1x1x16x16xbf16> to vector<1x16x16xbf16>
    %c0_9 = arith.constant 0 : index
    %c0_10 = arith.constant 0 : index
    %15 = vector.load %arg3[%c0_9, %c0_10] : memref<16x4xbf16, #tpu.memory_space<vmem>>, vector<16x4xbf16>
    %c0_11 = arith.constant 0 : index
    %c0_12 = arith.constant 0 : index
    %16 = vector.load %arg4[%c0_11, %c0_12] : memref<1x4xf32, #tpu.memory_space<vmem>>, vector<1x4xf32>
    %17 = vector.shape_cast %11 : vector<8x16x16xbf16> to vector<128x16xbf16>
    %cst = arith.constant dense<0.000000e+00> : vector<128x4xf32>
    %18 = tpu.matmul %17, %15, %cst {dimension_numbers = #tpu.dot_dimension_numbers<[1], [0], [0], [1], [0, 0, 1, 1], [], []>} : vector<128x16xbf16>, vector<16x4xbf16>, vector<128x4xf32> -> vector<128x4xf32>
    %19 = vector.broadcast %16 : vector<1x4xf32> to vector<128x4xf32>
    %20 = arith.addf %18, %19 : vector<128x4xf32>
    %cst_13 = arith.constant 0.000000e+00 : f32
    %21 = vector.broadcast %cst_13 : f32 to vector<128x4xf32>
    %22 = arith.maximumf %20, %21 : vector<128x4xf32>
    %c0_i32_14 = arith.constant 0 : i32
    %23 = arith.cmpi sgt, %1, %c0_i32_14 : i32
    %24 = vector.shape_cast %8 : vector<1x16x16xbf16> to vector<16x16xbf16>
    %cst_15 = arith.constant dense<0.000000e+00> : vector<16x4xf32>
    %25 = tpu.matmul %24, %15, %cst_15 {dimension_numbers = #tpu.dot_dimension_numbers<[1], [0], [0], [1], [0, 0, 1, 1], [], []>} : vector<16x16xbf16>, vector<16x4xbf16>, vector<16x4xf32> -> vector<16x4xf32>
    %26 = vector.broadcast %16 : vector<1x4xf32> to vector<16x4xf32>
    %27 = arith.addf %25, %26 : vector<16x4xf32>
    %cst_16 = arith.constant 0.000000e+00 : f32
    %28 = vector.broadcast %cst_16 : f32 to vector<16x4xf32>
    %29 = arith.maximumf %27, %28 : vector<16x4xf32>
    %cst_17 = arith.constant 0.000000e+00 : f32
    %30 = vector.broadcast %cst_17 : f32 to vector<16x4xf32>
    %31 = arith.select %23, %29, %30 : vector<16x4xf32>
    %c8_i32_18 = arith.constant 8 : i32
    %32 = arith.addi %1, %c8_i32_18 : i32
    %c16_i32 = arith.constant 16 : i32
    %33 = arith.cmpi slt, %32, %c16_i32 : i32
    %34 = vector.shape_cast %14 : vector<1x16x16xbf16> to vector<16x16xbf16>
    %cst_19 = arith.constant dense<0.000000e+00> : vector<16x4xf32>
    %35 = tpu.matmul %34, %15, %cst_19 {dimension_numbers = #tpu.dot_dimension_numbers<[1], [0], [0], [1], [0, 0, 1, 1], [], []>} : vector<16x16xbf16>, vector<16x4xbf16>, vector<16x4xf32> -> vector<16x4xf32>
    %36 = vector.broadcast %16 : vector<1x4xf32> to vector<16x4xf32>
    %37 = arith.addf %35, %36 : vector<16x4xf32>
    %cst_20 = arith.constant 0.000000e+00 : f32
    %38 = vector.broadcast %cst_20 : f32 to vector<16x4xf32>
    %39 = arith.maximumf %37, %38 : vector<16x4xf32>
    %cst_21 = arith.constant 0.000000e+00 : f32
    %40 = vector.broadcast %cst_21 : f32 to vector<16x4xf32>
    %41 = arith.select %33, %39, %40 : vector<16x4xf32>
    %42 = arith.truncf %31 : vector<16x4xf32> to vector<16x4xbf16>
    %43 = vector.shape_cast %42 : vector<16x4xbf16> to vector<1x16x4xbf16>
    %44 = arith.truncf %22 : vector<128x4xf32> to vector<128x4xbf16>
    %45 = vector.shape_cast %44 : vector<128x4xbf16> to vector<8x16x4xbf16>
    %46 = arith.truncf %41 : vector<16x4xf32> to vector<16x4xbf16>
    %47 = vector.shape_cast %46 : vector<16x4xbf16> to vector<1x16x4xbf16>
    %48 = tpu.concatenate %43, %45, %47 in 0 : vector<1x16x4xbf16>, vector<8x16x4xbf16>, vector<1x16x4xbf16> -> vector<10x16x4xbf16>
    %cst_22 = arith.constant 0.000000e+00 : bf16
    %49 = vector.broadcast %cst_22 : bf16 to vector<10x1x4xbf16>
    %50 = vector.extract_strided_slice %48 {offsets = [0, 0, 0], sizes = [10, 15, 4], strides = [1, 1, 1]} : vector<10x16x4xbf16> to vector<10x15x4xbf16>
    %51 = tpu.concatenate %49, %50 in 1 : vector<10x1x4xbf16>, vector<10x15x4xbf16> -> vector<10x16x4xbf16>
    %52 = vector.extract_strided_slice %48 {offsets = [0, 1, 0], sizes = [10, 15, 4], strides = [1, 1, 1]} : vector<10x16x4xbf16> to vector<10x15x4xbf16>
    %53 = tpu.concatenate %52, %49 in 1 : vector<10x15x4xbf16>, vector<10x1x4xbf16> -> vector<10x16x4xbf16>
    %54 = vector.extract_strided_slice %51 {offsets = [0, 0, 0], sizes = [8, 16, 4], strides = [1, 1, 1]} : vector<10x16x4xbf16> to vector<8x16x4xbf16>
    %55 = vector.extract_strided_slice %48 {offsets = [0, 0, 0], sizes = [8, 16, 4], strides = [1, 1, 1]} : vector<10x16x4xbf16> to vector<8x16x4xbf16>
    %56 = vector.extract_strided_slice %53 {offsets = [0, 0, 0], sizes = [8, 16, 4], strides = [1, 1, 1]} : vector<10x16x4xbf16> to vector<8x16x4xbf16>
    %57 = vector.extract_strided_slice %51 {offsets = [1, 0, 0], sizes = [8, 16, 4], strides = [1, 1, 1]} : vector<10x16x4xbf16> to vector<8x16x4xbf16>
    %58 = vector.extract_strided_slice %48 {offsets = [1, 0, 0], sizes = [8, 16, 4], strides = [1, 1, 1]} : vector<10x16x4xbf16> to vector<8x16x4xbf16>
    %59 = vector.extract_strided_slice %53 {offsets = [1, 0, 0], sizes = [8, 16, 4], strides = [1, 1, 1]} : vector<10x16x4xbf16> to vector<8x16x4xbf16>
    %60 = vector.extract_strided_slice %51 {offsets = [2, 0, 0], sizes = [8, 16, 4], strides = [1, 1, 1]} : vector<10x16x4xbf16> to vector<8x16x4xbf16>
    %61 = vector.extract_strided_slice %48 {offsets = [2, 0, 0], sizes = [8, 16, 4], strides = [1, 1, 1]} : vector<10x16x4xbf16> to vector<8x16x4xbf16>
    %62 = vector.extract_strided_slice %53 {offsets = [2, 0, 0], sizes = [8, 16, 4], strides = [1, 1, 1]} : vector<10x16x4xbf16> to vector<8x16x4xbf16>
    %63 = tpu.concatenate %54, %55, %56, %57, %58, %59, %60, %61, %62 in 2 : vector<8x16x4xbf16>, vector<8x16x4xbf16>, vector<8x16x4xbf16>, vector<8x16x4xbf16>, vector<8x16x4xbf16>, vector<8x16x4xbf16>, vector<8x16x4xbf16>, vector<8x16x4xbf16>, vector<8x16x4xbf16> -> vector<8x16x36xbf16>
    %64 = vector.shape_cast %63 : vector<8x16x36xbf16> to vector<128x36xbf16>
    %c0_23 = arith.constant 0 : index
    %c0_24 = arith.constant 0 : index
    %65 = vector.load %arg5[%c0_23, %c0_24] : memref<36x4xbf16, #tpu.memory_space<vmem>>, vector<36x4xbf16>
    %cst_25 = arith.constant dense<0.000000e+00> : vector<128x4xf32>
    %66 = tpu.matmul %64, %65, %cst_25 {dimension_numbers = #tpu.dot_dimension_numbers<[1], [0], [0], [1], [0, 0, 1, 1], [], []>} : vector<128x36xbf16>, vector<36x4xbf16>, vector<128x4xf32> -> vector<128x4xf32>
    %c0_26 = arith.constant 0 : index
    %c0_27 = arith.constant 0 : index
    %67 = vector.load %arg6[%c0_26, %c0_27] : memref<1x4xf32, #tpu.memory_space<vmem>>, vector<1x4xf32>
    %68 = vector.broadcast %67 : vector<1x4xf32> to vector<128x4xf32>
    %69 = arith.addf %66, %68 : vector<128x4xf32>
    %cst_28 = arith.constant 0.000000e+00 : f32
    %70 = vector.broadcast %cst_28 : f32 to vector<128x4xf32>
    %71 = arith.maximumf %69, %70 : vector<128x4xf32>
    %72 = arith.truncf %71 : vector<128x4xf32> to vector<128x4xbf16>
    %c0_29 = arith.constant 0 : index
    %c0_30 = arith.constant 0 : index
    %73 = vector.load %arg7[%c0_29, %c0_30] : memref<4x16xbf16, #tpu.memory_space<vmem>>, vector<4x16xbf16>
    %cst_31 = arith.constant dense<0.000000e+00> : vector<128x16xf32>
    %74 = tpu.matmul %72, %73, %cst_31 {dimension_numbers = #tpu.dot_dimension_numbers<[1], [0], [0], [1], [0, 0, 1, 1], [], []>} : vector<128x4xbf16>, vector<4x16xbf16>, vector<128x16xf32> -> vector<128x16xf32>
    %c0_32 = arith.constant 0 : index
    %c0_33 = arith.constant 0 : index
    %75 = vector.load %arg8[%c0_32, %c0_33] : memref<1x16xf32, #tpu.memory_space<vmem>>, vector<1x16xf32>
    %76 = vector.broadcast %75 : vector<1x16xf32> to vector<128x16xf32>
    %77 = arith.addf %74, %76 : vector<128x16xf32>
    %78 = vector.shape_cast %11 : vector<8x16x16xbf16> to vector<128x16xbf16>
    %79 = arith.extf %78 : vector<128x16xbf16> to vector<128x16xf32>
    %80 = arith.addf %77, %79 : vector<128x16xf32>
    %cst_34 = arith.constant 0.000000e+00 : f32
    %81 = vector.broadcast %cst_34 : f32 to vector<128x16xf32>
    %82 = arith.maximumf %80, %81 : vector<128x16xf32>
    %83 = vector.shape_cast %82 : vector<128x16xf32> to vector<1x8x16x16xf32>
    %84 = arith.truncf %83 : vector<1x8x16x16xf32> to vector<1x8x16x16xbf16>
    %c0_35 = arith.constant 0 : index
    %c0_36 = arith.constant 0 : index
    %c0_37 = arith.constant 0 : index
    %c0_38 = arith.constant 0 : index
    %85 = vector.load %arg9[%c0_35, %c0_36, %c0_37, %c0_38] : memref<1x8x16x16xbf16, #tpu.memory_space<vmem>>, vector<1x8x16x16xbf16>
    tpu.vector_store %arg9[%c0_35, %c0_36, %c0_37, %c0_38], %84 {strides = array<i32>} : memref<1x8x16x16xbf16, #tpu.memory_space<vmem>>, vector<1x8x16x16xbf16>,
    return
  }
  func.func @transform_0(%arg0: i32, %arg1: i32) -> (i32, i32, i32, i32) {
    %c0_i32 = arith.constant 0 : i32
    %c0_i32_0 = arith.constant 0 : i32
    %c0_i32_1 = arith.constant 0 : i32
    %c0_i32_2 = arith.constant 0 : i32
    return %arg0, %c0_i32, %c0_i32_0, %c0_i32_1 : i32, i32, i32, i32
  }
  func.func @transform_1(%arg0: i32, %arg1: i32) -> (i32, i32) {
    %c0_i32 = arith.constant 0 : i32
    %c0_i32_0 = arith.constant 0 : i32
    %c0_i32_1 = arith.constant 0 : i32
    return %c0_i32, %c0_i32_0 : i32, i32
  }
  func.func @transform_2(%arg0: i32, %arg1: i32) -> (i32, i32) {
    %c0_i32 = arith.constant 0 : i32
    %c0_i32_0 = arith.constant 0 : i32
    %c0_i32_1 = arith.constant 0 : i32
    return %c0_i32, %c0_i32_0 : i32, i32
  }
  func.func @transform_3(%arg0: i32, %arg1: i32) -> (i32, i32) {
    %c0_i32 = arith.constant 0 : i32
    %c0_i32_0 = arith.constant 0 : i32
    %c0_i32_1 = arith.constant 0 : i32
    return %c0_i32, %c0_i32_0 : i32, i32
  }
  func.func @transform_4(%arg0: i32, %arg1: i32) -> (i32, i32) {
    %c0_i32 = arith.constant 0 : i32
    %c0_i32_0 = arith.constant 0 : i32
    %c0_i32_1 = arith.constant 0 : i32
    return %c0_i32, %c0_i32_0 : i32, i32
  }
  func.func @transform_5(%arg0: i32, %arg1: i32) -> (i32, i32) {
    %c0_i32 = arith.constant 0 : i32
    %c0_i32_0 = arith.constant 0 : i32
    %c0_i32_1 = arith.constant 0 : i32
    return %c0_i32, %c0_i32_0 : i32, i32
  }
  func.func @transform_6(%arg0: i32, %arg1: i32) -> (i32, i32) {
    %c0_i32 = arith.constant 0 : i32
    %c0_i32_0 = arith.constant 0 : i32
    %c0_i32_1 = arith.constant 0 : i32
    return %c0_i32, %c0_i32_0 : i32, i32
  }
  func.func @transform_7(%arg0: i32, %arg1: i32) -> (i32, i32, i32, i32) {
    %c0_i32 = arith.constant 0 : i32
    %c0_i32_0 = arith.constant 0 : i32
    %c0_i32_1 = arith.constant 0 : i32
    return %arg0, %arg1, %c0_i32, %c0_i32_0 : i32, i32, i32, i32
  }
}

</mosaic_0001>

<bundles_post_ra>
// kernel: tpu_custom_call.1
= control target key start
LH: loop header
LB: loop body
LE: loop exit
PB: predicated region body
PF: predicated region fallthrough
CT: control target
= control target key end

     0   :  { %s2954_s0 = inlined_call_operand.hbm [shape: bf16[2,16,16,16], index: 0, kind: input, shape index: {}]   ;;  %s2955_s1 = inlined_call_operand.vmem [shape: bf16[16,4], index: 1, kind: input, shape index: {}]   ;;  %s2956_s2 = inlined_call_operand.vmem [shape: f32[1,4], index: 2, kind: input, shape index: {}]   ;;  %s2957_s3 = inlined_call_operand.vmem [shape: bf16[36,4], index: 3, kind: input, shape index: {}]   ;;  %s2958_s4 = inlined_call_operand.vmem [shape: f32[1,4], index: 4, kind: input, shape index: {}]   ;;  %s2959_s5 = inlined_call_operand.vmem [shape: bf16[4,16], index: 5, kind: input, shape index: {}]   ;;  %s2960_s6 = inlined_call_operand.vmem [shape: f32[1,16], index: 6, kind: input, shape index: {}]   ;;  %s2961_s7 = inlined_call_operand.hbm [shape: bf16[2,16,16,16], index: 7, kind: output, shape index: {}]  }
   0x1   :  { %2968 = sst [smem:[#allocation12_spill]] %s2961_s7 }
   0x2   :  { %12 = vsyncpa [#allocation3], 0 }
   0x3   :  { %14 = vsyncpa [#allocation3 + $0x1], 0 }
   0x4   :  { %15 = vsyncpa [#allocation4], 0 }
   0x5   :  { %17 = vsyncpa [#allocation4 + $0x1], 0  ;;  %s2207_s24 = smov 0   ;;  %s2209_s25 = smov 0  }
   0x6   :  { %s2211_s26 = smov 0   ;;  %s2213_s27 = smov 0  }
   0x7   :  { %s2215_s28 = smov 0   ;;  %s2217_s29 = smov 0  }
   0x8   :  { %s2219_s30 = smov 0   ;;  %s2221_s8 = smov 0  }
   0x9   :  { %s2223_s9 = smov 0   ;;  %s2225_s10 = smov 0  }
   0xa   :  { %s2227_s11 = smov 0  }
   0xb LB: > { %2969 = sst [smem:[#allocation8_spill]] %s2142_s9  ;;  %s1642_s12 = sadd.s32 4294967295, %s2150_s11   ;;  %s2150_s11 = sphi %s2227_s11, %s23_s11   ;;  %s2146_s10 = sphi %s2225_s10, %s2994_s10   ;;  %s2142_s9 = sphi %s2223_s9, %s2993_s9   ;;  %s2138_s8 = sphi %s2221_s8, %s2992_s8   ;;  %s2134_s30 = sphi %s2219_s30, %s2991_s30   ;;  %s2130_s29 = sphi %s2217_s29, %s3000_s29   ;;  %s2126_s28 = sphi %s2215_s28, %s2999_s28   ;;  %s2122_s27 = sphi %s2213_s27, %s2998_s27   ;;  %s2118_s26 = sphi %s2211_s26, %s2997_s26   ;;  %s2114_s25 = sphi %s2209_s25, %s2996_s25   ;;  %s2110_s24 = sphi %s2207_s24, %s2995_s24  }
   0xc   : > { %2970 = sst [smem:[#allocation9_spill]] %s2146_s10  ;;  %s1643_s13 = sadd.s32 4294967294, %s2150_s11  }
   0xd   : > { %s32_s14 = sadd.s32 1, %s2142_s9  ;;  %s35_s15 = sadd.s32 1, %s2146_s10 }
   0xe   : > { %p33_p0 = scmp.ge.s32.totalorder %s32_s14, 2  ;;  %s42_s16 = sadd.s32 1, %s2130_s29 }
   0xf   : > { %p49_p1 = scmp.ne.s32.totalorder %s2130_s29, %s2126_s28  ;;  %p50_p2 = scmp.eq.s32.totalorder %s2150_s11, 0 }
  0x10   : > { %s3002_s14 = smov (%p33_p0, %s32_s14), 0  ;;  %s3004_s15 = smov (!%p33_p0, %s35_s15), %s2146_s10 }
  0x11   : > { %2971 = sst [smem:[#allocation10_spill]] %s3002_s14  ;;  %p2271_p3 = por %p50_p2, %p49_p1 }
  0x12   : > { %p55_p4 = scmp.ne.s32.totalorder %s2126_s28, %s2122_s27  ;;  %p37_p5 = scmp.ge.s32.totalorder %s3004_s15, 2 }
  0x13   : > { %p56_p6 = scmp.eq.s32.totalorder %s1642_s12, 0  ;;  %s192_s18 = ssub.s32 %s2142_s9, %s3002_s14 }
  0x14   : > { %s196_s19 = sadd.s32 1, %s2118_s26  ;;  %s3006_s15 = smov (%p37_p5, %s3004_s15), 0 }
  0x15   : > { %2973 = sst [smem:[#allocation11_spill]] %s3006_s15  ;;  %p2281_p7 = por %p56_p6, %p55_p4 }
  0x16   : > { %p206_p8 = scmp.ne.s32.totalorder %s2118_s26, %s2114_s25  ;;  %s39_s21 = ssub.s32 %s2146_s10, %s3006_s15 }
  0x17   : > { %p207_p9 = scmp.eq.s32.totalorder %s1642_s12, 3  ;;  %p40_p10 = scmp.eq.s32.totalorder %s39_s21, 0 }
  0x18   : > { %s193_s22 = sor.u32 %s192_s18, %s39_s21  ;;  %p212_p13 = scmp.ne.s32.totalorder %s2114_s25, %s2110_s24 }
  0x19   : > { %p194_p11 = scmp.eq.s32.totalorder %s193_s22, 0  ;;  %p2289_p12 = por %p207_p9, %p206_p8 }
  0x1a   : > { %s2294_s27 = scalar_select %p40_p10, %s2130_s29, %s42_s16  }
  0x1b   : > { %s2975_s23 = scalar_select %p2289_p12, 1, 0 }
  0x1c   : > { %s2297_s14 = scalar_select %p194_p11, %s2118_s26, %s196_s19  }
  0x1d   : > { %p213_p0 = scmp.eq.s32.totalorder %s1643_s13, 3  ;;  %p1865_p1 = scmp.lt.s32.totalorder %s2150_s11, 4 }
  0x1e   : > { %s251_s12 = sand.u32 1, %s2130_s29   ;;  %s1726_s21 = sshll.u32 %s2146_s10, 11 }
  0x1f   : > { %p2302_p2 = por %p213_p0, %p212_p13  ;;  %s1646_s18 = sshll.u32 %s251_s12, 7 }
  0x20   : > { %s2311_s7 = scalar_lea.hbm %s2954_s0, %s1726_s21  ;;  %s255_s16 = scalar_lea.vmem [#allocation2], %s1646_s18 }
  0x21   : > { %s2976_s9 = scalar_select %p2302_p2, 1, 0 }
  0x22   : > { %s262_s19 = sshll.u32 %s255_s16, 4  ;;  %p2317_p4 = pnand %p1865_p1, %p2271_p3  ;;  %s2313_s19 = int_to_ptr.vmem [resolvable:$true] %s262_s19 }
  0x23   : > { %s2322_s10 = scalar_lea.sflag [#allocation3], %s251_s12  ;;  %s1998_s15 = scalar_lea.hbm %s2311_s7, 2048 }
  0x24   : > { %p1999_p6 = scmp.ne.s32.totalorder %s2311_s7, %s1998_s15  ;;  %p2000_p8 = pneg %p2317_p4 }
  0x25   : > { %s2003_s17 = scalar_lea.hbm %s2954_s0, 4096  ;;  %p2004_p3 = scmp.lt.u32.totalorder %s2311_s7, %s2954_s0 }
  0x26   : > { %p2001_p9 = pnand %p2000_p8, %p1999_p6  ;;  %p2005_p11 = scmp.lt.u32.totalorder %s2003_s17, %s1998_s15 }
  0x27   : > { %p2007_p0 = scmp.lt.u32.totalorder %s1998_s15, %s2311_s7 }
  0x28   : > { %p2002_p10 = pneg %p2001_p9  ;;  %p2006_p13 = por %p2005_p11, %p2004_p3 }
  0x2a   : > { %p2008_p1 = por %p2007_p0, %p2006_p13 }
  0x2c   : > { %p2009_p5 = pnand %p2008_p1, %p2002_p10 }
  0x2e   : > { %2012 = shalt.err (!%p2009_p5)
}
  0x2f   : > { %s2013_s12 = scalar_lea.vmem %s2313_s19, 2048  ;;  %s2152_s18 = smov [#allocation2]  }
  0x30   : > { %p2014_p6 = scmp.ne.s32.totalorder %s2313_s19, %s2013_s12  ;;  %s2018_s21 = sshll.u32 %s2152_s18, 4  ;;  %s2019_s21 = int_to_ptr.vmem [resolvable:$false] %s2018_s21 }
  0x31   : > { %s2020_s22 = scalar_lea.vmem %s2019_s21, 4096  ;;  %p2021_p12 = scmp.lt.s32.totalorder %s2313_s19, %s2019_s21 }
  0x32   : > { %p2016_p9 = pnand %p2014_p6, %p2000_p8  ;;  %p2022_p3 = scmp.lt.s32.totalorder %s2020_s22, %s2013_s12 }
  0x34   : > { %p2017_p2 = pneg %p2016_p9  ;;  %p2023_p11 = por %p2022_p3, %p2021_p12 }
  0x36   : > { %p2024_p13 = pnand %p2023_p11, %p2017_p2 }
  0x38   : > { %2027 = shalt.err (!%p2024_p13)
}
  0x39   : > { %s2153_s15 = smov 64   ;;  %s2154_s17 = smov 4  }
  0x3a   : > { %1860 = dma.hbm_to_vmem [thread:$0]  (!%p2317_p4), %s2311_s7, 2048, %s2313_s19, %s2322_s10, %s2153_s15, %s2153_s15, %s2154_s17  }
  0x3b   : > { %p270_p5 = scmp.lt.s32.totalorder %s2150_s11, 5  ;;  %p2978_p8 = scmp.ge.s32.totalorder %s2150_s11, 1 }
  0x3d   : > { %p271_p10 = pnand %p2978_p8, %p270_p5 }
  0x3e   : > { %s276_s16 = sand.u32 (!%p271_p10), 1, %s2126_s28  }
  0x3f   : > { %274 = sbr.rel (%p271_p10) target bundleno = 1002 (0x3ea), region = 48  ;;  %s1650_s12 = sshll.u32 (!%p271_p10), %s276_s16, 7 }
  0x40   : > { %s277_s18 = scalar_lea.sflag (!%p271_p10), [#allocation3], %s276_s16  ;;  %s280_s21 = scalar_lea.vmem (!%p271_p10), [#allocation2], %s1650_s12 }
  0x46   : > { %2101 = dma.done.wait (%p2281_p7), %s277_s18, 2048  }
  0x47   : > { %2103 = vsyncadd (%p2281_p7), %s277_s18, 4294965248  ;;  %s1729_s22 = sshll.u32 %s2134_s30, 6  ;;  %s2360_s13 = sshll.u32 %s2134_s30, 3  ;;  %v2155_v0 = vmov 0.0   ;;  %vm2156_vm0 = vmmov 0   ;;  %v1968_v1 = vld [vmem:[%s2955_s1] sm:$0xff]  }
  0x48   : > { %1799 = vmatprep.subr.bf16.mxu1 %v2155_v0  ;;  %1801 = vmatprep.mubr.msk.bf16.mxu1 %vm2156_vm0, %v2155_v0  ;;  %s1653_s7 = sadd.s32 4294967295, %s2360_s13  ;;  %s2365_s10 = sadd.s32 8, %s2360_s13  ;;  %vm404_vm1 = vcmask 130048   ;;  %v2400_v12 = vld [vmem:[%s2956_s2] ss:$0 sm:$0xff]  ;;  %vm789_vm3 = vcmask 1047552  }
  0x49   : > { %p315_p12 = scmp.gt.s32.totalorder %s1653_s7, 0  ;;  %s2367_s20 = scalar_lea.vmem %s280_s21, %s1729_s22 [#allocation2]  ;;  %1781 = vmatprep.subr.bf16.mxu0 %v1968_v1  ;;  %1800 = vmatpush3.bf16.msra.mxu1 %v1968_v1  ;;  %vm790_vm4 = vsmask.f32 7424  ;;  %vm746_vm6 = vcmask 1040384   ;;  %vm747_vm7 = vsmask.f32 256 }
  0x4a   : > { %p318_p7 = scmp.lt.s32.totalorder %s2365_s10, 15  ;;  %v328_v2 = vld [vmem:[%s2367_s20] sm:$0xff]   ;;  %v2376_v4 = vld [vmem:[%s2367_s20 + $0x8] sm:$0xff]   ;;  %v332_v5 = vld [vmem:[%s2367_s20 + $0x10] sm:$0xff]   ;;  %1782 = vmatpush3.bf16.msra.mxu0 %v1968_v1  ;;  %1805 = vmatprep.subr.bf16.mxu1 %v2155_v0  ;;  %p542_p2 = scmp.gt.s32.totalorder %s2360_s13, 0  ;;  %vm1146_vm10 = vcmask 1041408  }
  0x4b   : > { %s3008_s7 = smov (!%p315_p12, %s1653_s7), 0  ;;  %1783 = vmatprep.mubr.msk.bf16.mxu0 %vm404_vm1, %v328_v2  ;;  %v334_v6 = vld [vmem:[%s2367_s20 + $0x18] sm:$0xff]   ;;  %v336_v7 = vld [vmem:[%s2367_s20 + $0x20] sm:$0xff]   ;;  %v338_v9 = vld [vmem:[%s2367_s20 + $0x28] sm:$0xff]   ;;  %p599_p4 = scmp.lt.s32.totalorder %s2365_s10, 16  ;;  %vm959_vm11 = vcmask 31744  }
  0x4c   : > { %s319_s19 = scalar_select %p318_p7, %s2365_s10, 15  ;;  %v340_v10 = vld [vmem:[%s2367_s20 + $0x30] sm:$0xff]   ;;  %v342_v11 = vld [vmem:[%s2367_s20 + $0x38] sm:$0xff]   ;;  %vm2441_vm5 = vmand %vm789_vm3, %vm790_vm4  ;;  %vm984_vm12 = vcmask 64512   ;;  %vm1001_vm13 = vcmask 97280   ;;  %vm1051_vm14 = vcmask 195584  }
  0x4d   : > { %s1727_s15 = sshll.u32 %s3008_s7, 3  ;;  %1784 = vmatmul.mubr.msk.bf16.vlgmr.msra.gmra.mrb[0].mxu0 %vm404_vm1, %v2376_v4  ;;  %s2157_s10 = smov 16   ;;  %vm2467_vm9 = vmand %vm746_vm6, %vm747_vm7  ;;  %vm1034_vm15 = vcmask 162816   ;;  %vm1129_vm3 = vcmask 293888  }
  0x4e   : > { %s322_s12 = scalar_lea.vmem %s280_s21, %s1727_s15 [#allocation2]  ;;  %s1730_s18 = sshll.u32 %s319_s19, 3  ;;  %1787 = vmatprep.mubr.msk.bf16.mxu0 %vm404_vm1, %v332_v5 }
  0x4f   : > { %v1970_v3 = vld [vmem:[%s322_s12] sm:$0xff]   ;;  %s346_s22 = scalar_lea.vmem %s280_s21, %s1730_s18 [#allocation2]  ;;  %s2158_s15 = smov 4  }
  0x50   : > { %1802 = vmatmul.mubr.msk.bf16.vlgmr.msra.gmra.mrb[0].mxu1 %vm404_vm1, %v1970_v3  ;;  %v1974_v8 = vld [vmem:[%s346_s22] sm:$0xff]   ;;  %s594_s21 = scalar_select %p542_p2, 1, 0 }
  0x51   : > { %1806 = vmatpush3.bf16.msra.mxu1 %v1968_v1  ;;  %1807 = vmatprep.mubr.msk.bf16.mxu1 %vm2156_vm0, %v2155_v0  ;;  %s2417_s13 = scalar_select %p599_p4, 1, 0  ;;  %vm1068_vm0 = vcmask 228352  }
  0x52   : > { %v595_v13 = vstv %s594_s21  ;;  %s2159_s17 = smov 28   ;;  %s2160_s16 = smov 8  }
  0x53   : > { %vm2403_vm2 = vcmp.eq.s32.totalorder %v595_v13, 1  ;;  %v652_v51 = vstv %s2417_s13  ;;  %s2161_s12 = smov 12   ;;  %s2162_s18 = smov 24  }
  0x54   : > { %vm2454_vm8 = vcmp.eq.s32.totalorder %v652_v51, 1  ;;  %s2163_s22 = smov 20   ;;  %s2164_s21 = smov 32  }
  0x55   : > { %1788 = vmatmul.mubr.msk.bf16.gmra.mrb[4].mxu0 %vm404_vm1, %v334_v6  ;;  %s1747_s13 = sshll.u32 %s2134_s30, 4  ;;  %p2988_p1 = scmp.ne.s32.totalorder %s2975_s23, 0 }
  0x56   : > { %1791 = vmatprep.mubr.msk.bf16.mxu0 %vm404_vm1, %v336_v7 }
  0x58   : > { %1808 = vmatmul.mubr.msk.bf16.vlgmr.msra.gmra.mrb[4].mxu1 %vm404_vm1, %v1974_v8 }
  0x5d   : > { %1792 = vmatmul.mubr.msk.bf16.gmra.mrb[8].mxu0 %vm404_vm1, %v338_v9 }
  0x5e   : > { %1795 = vmatprep.mubr.msk.bf16.mxu0 %vm404_vm1, %v340_v10 }
  0x65   : > { %1796 = vmatmul.mubr.msk.bf16.gmra.mrb[12].mxu0 %vm404_vm1, %v342_v11 }
 0x120   : > { %v1785_v16 = vpop.f32.mrb[0].mxu0 }
 0x121   : > { %v472_v19 = vadd.f32 %v1785_v16, %v2400_v12  ;;  %v463_v20 = vpop.f32.mrb[1].mxu0 }
 0x122   : > { %v464_v23 = vadd.f32 %v2400_v12, %v463_v20  ;;  %v1786_v25 = vpop.f32.mrb[2].mxu0 }
 0x123   : > { %v585_v14 = vpop.f32.mrb[0].mxu1  ;;  %v528_v27 = vmax.f32 %v472_v19, 0.0  ;;  %v475_v28 = vadd.f32 %v1786_v25, %v2400_v12  ;;  %v466_v29 = vpop.f32.mrb[3].mxu0 }
 0x124   : > { %v586_v15 = vadd.f32 %v2400_v12, %v585_v14  ;;  %v1803_v17 = vpop.f32.mrb[1].mxu1  ;;  %v467_v32 = vadd.f32 %v2400_v12, %v466_v29  ;;  %v526_v34 = vmax.f32 %v464_v23, 0.0 }
 0x125   : > { %v588_v21 = vpop.f32.mrb[2].mxu1  ;;  %v529_v33 = vmax.f32 %v475_v28, 0.0 }
 0x126   : > { %v592_v22 = vmax.f32 %v586_v15, 0.0  ;;  %v589_v24 = vadd.f32 %v2400_v12, %v588_v21  ;;  %v1804_v26 = vpop.f32.mrb[3].mxu1  ;;  %v527_v36 = vmax.f32 %v467_v32, 0.0 }
 0x127   : > { %v2419_v37 = vpack.c.bf16 %v529_v33, %v528_v27 }
 0x128   : > { %v597_v30 = vsel %vm2403_vm2, %v592_v22, 0.0  ;;  %v593_v31 = vmax.f32 %v589_v24, 0.0  ;;  %v2423_v40 = vpack.c.bf16 %v527_v36, %v526_v34  ;;  %v1789_v41 = vpop.f32.mrb[4].mxu0 }
 0x129   : > { %877 = vrot.lane.b32.xlu1 %v2419_v37, %s2157_s10  ;;  %v488_v44 = vadd.f32 %v1789_v41, %v2400_v12  ;;  %v479_v45 = vpop.f32.mrb[5].mxu0  ;;  %v681_v46 = vshrl.u32 %v2419_v37, 16  ;;  %v684_v56 = vshll.u32 %v2419_v37, 16 }
 0x12a   : > { %v598_v35 = vsel %vm2403_vm2, %v593_v31, 0.0  ;;  %v480_v48 = vadd.f32 %v2400_v12, %v479_v45  ;;  %v1790_v49 = vpop.f32.mrb[6].mxu0  ;;  %v677_v2 = vshll.u32 %v2423_v40, 16  ;;  %v674_v28 = vshrl.u32 %v2423_v40, 16 }
 0x12b   : > { %v2421_v38 = vpack.c.bf16 %v598_v35, %v597_v30  ;;  %v642_v39 = vpop.f32.mrb[4].mxu1  ;;  %v532_v55 = vmax.f32 %v488_v44, 0.0  ;;  %v482_v57 = vpop.f32.mrb[7].mxu0  ;;  %v683_v60 = vrot.slane %v681_v46, 7  ;;  %v491_v61 = vadd.f32 %v1790_v49, %v2400_v12 }
 0x12c   : > { %v1809_v42 = vpop.f32.mrb[5].mxu1  ;;  %v643_v50 = vadd.f32 %v2400_v12, %v642_v39  ;;  %v530_v59 = vmax.f32 %v480_v48, 0.0  ;;  %v483_v62 = vadd.f32 %v2400_v12, %v482_v57  ;;  %v763_v10 = vrot.slane %v684_v56, 1 }
 0x12d   : > { %810 = vrot.lane.b32.xlu0 %v2421_v38, %s2158_s15  ;;  %v670_v43 = vshll.u32 %v2421_v38, 16  ;;  %v645_v47 = vpop.f32.mrb[6].mxu1  ;;  %v667_v53 = vshrl.u32 %v2421_v38, 16  ;;  %814 = vrot.lane.b32.xlu1 %v2419_v37, %s2158_s15  ;;  %v533_v0 = vmax.f32 %v491_v61, 0.0  ;;  %v686_v7 = vor.u32 %v684_v56, %v683_v60 }
 0x12e   : > { %v1810_v52 = vpop.f32.mrb[7].mxu1  ;;  %v531_v1 = vmax.f32 %v483_v62, 0.0  ;;  %v649_v5 = vmax.f32 %v643_v50, 0.0  ;;  %v646_v14 = vadd.f32 %v2400_v12, %v645_v47  ;;  %v761_v18 = vrot.slane %v677_v2, 1 }
 0x12f   : > { %v759_v54 = vrot.slane %v670_v43, 1  ;;  %v2458_v8 = vpack.c.bf16 %v533_v0, %v532_v55  ;;  %v669_v17 = vrot.slane %v667_v53, 7  ;;  %v2481_v26 = vsel %vm2467_vm9, 0, %v686_v7 }
 0x130   : > { %v2460_v9 = vpack.c.bf16 %v531_v1, %v530_v59  ;;  %v1793_v11 = vpop.f32.mrb[8].mxu0  ;;  %v654_v21 = vsel %vm2454_vm8, %v649_v5, 0.0  ;;  %v650_v22 = vmax.f32 %v646_v14, 0.0  ;;  %v764_v27 = vor.u32 %v763_v10, %v681_v46 }
 0x131   : > { %926 = vrot.lane.b32.xlu0 %v2419_v37, %s2159_s17  ;;  %v760_v63 = vor.u32 %v759_v54, %v667_v53  ;;  %v504_v15 = vadd.f32 %v1793_v11, %v2400_v12  ;;  %v495_v16 = vpop.f32.mrb[9].mxu0  ;;  %v762_v33 = vor.u32 %v761_v18, %v674_v28  ;;  %v2497_v37 = vor.u32 %v670_v43, %v669_v17 }
 0x132   : > { %v496_v19 = vadd.f32 %v2400_v12, %v495_v16  ;;  %v1794_v20 = vpop.f32.mrb[10].mxu0  ;;  %v655_v30 = vsel %vm2454_vm8, %v650_v22, 0.0  ;;  %v794_v39 = vsel %vm2441_vm5, %v764_v27, 0  ;;  %v676_v42 = vrot.slane %v674_v28, 7 }
 0x133   : > { %v792_v3 = vsel %vm2441_vm5, %v760_v63, 0  ;;  %v536_v23 = vmax.f32 %v504_v15, 0.0  ;;  %v507_v24 = vadd.f32 %v1794_v20, %v2400_v12  ;;  %v498_v25 = vpop.f32.mrb[11].mxu0  ;;  %v2491_v34 = vpack.c.bf16 %v655_v30, %v654_v21 }
 0x134   : > { %834 = vrot.lane.b32.xlu1 %v792_v3, %s2160_s16  ;;  %v499_v29 = vadd.f32 %v2400_v12, %v498_v25  ;;  %v534_v31 = vmax.f32 %v496_v19, 0.0  ;;  %v793_v38 = vsel %vm2441_vm5, %v762_v33, 0  ;;  %v679_v0 = vor.u32 %v677_v2, %v676_v42  ;;  %v1979_v42 = vld [vmem:[%s2957_s3] sm:$0xff]  }
 0x135   : > { %812 = vrot.lane.b32.xlu0 %v2423_v40, %s2158_s15  ;;  %v537_v32 = vmax.f32 %v507_v24, 0.0  ;;  %v733_v55 = vshll.u32 %v2491_v34, 16  ;;  %v749_v5 = vsel %vm2467_vm9, 0, %v2497_v37  ;;  %v695_v27 = vshrl.u32 %v2458_v8, 16  ;;  %1811 = vmatprep.subr.bf16.mxu1 %v1979_v42 }
 0x136   : > { %v535_v35 = vmax.f32 %v499_v29, 0.0  ;;  %v2558_v25 = vsel %vm2467_vm9, 0, %v679_v0  ;;  %1812 = vmatpush3.bf16.msra.mxu1 %v1979_v42  ;;  %vm1085_vm2 = vcmask 261120  }
 0x137   : > { %v2493_v36 = vpack.c.bf16 %v537_v32, %v536_v23  ;;  %v777_v14 = vrot.slane %v733_v55, 1 }
 0x138   : > { %860 = vrot.lane.b32.xlu1 %v2481_v26, %s2161_s12  ;;  %v1797_v41 = vpop.f32.mrb[12].mxu0  ;;  %v2504_v44 = vpack.c.bf16 %v535_v35, %v534_v31 }
 0x139   : > { %875 = vrot.lane.b32.xlu0 %v2423_v40, %s2157_s10  ;;  %v709_v45 = vshrl.u32 %v2493_v36, 16  ;;  %v511_v46 = vpop.f32.mrb[13].mxu0  ;;  %v712_v43 = vshll.u32 %v2493_v36, 16  ;;  %v520_v47 = vadd.f32 %v1797_v41, %v2400_v12 }
 0x13a   : > { %v512_v48 = vadd.f32 %v2400_v12, %v511_v46  ;;  %v1798_v49 = vpop.f32.mrb[14].mxu0  ;;  %v702_v53 = vshrl.u32 %v2504_v44, 16  ;;  %v705_v54 = vshll.u32 %v2504_v44, 16  ;;  %v698_v46 = vshll.u32 %v2458_v8, 16 }
 0x13b   : > { %v711_v50 = vrot.slane %v709_v45, 7  ;;  %v523_v51 = vadd.f32 %v1798_v49, %v2400_v12  ;;  %v514_v52 = vpop.f32.mrb[15].mxu0  ;;  %v540_v56 = vmax.f32 %v520_v47, 0.0  ;;  %v771_v59 = vrot.slane %v712_v43, 1 }
 0x13c   : > { %894 = vrot.lane.b32.xlu1 %v794_v39, %s2163_s22  ;;  %v538_v57 = vmax.f32 %v512_v48, 0.0  ;;  %v515_v62 = vadd.f32 %v2400_v12, %v514_v52  ;;  %v704_v63 = vrot.slane %v702_v53, 7  ;;  %v769_v3 = vrot.slane %v705_v54, 1  ;;  %v1980_v48 = vld [vmem:[%s2957_s3 + $0x8] sm:$0xff]  }
 0x13d   : > { %909 = vrot.lane.b32.xlu0 %v2481_v26, %s2162_s18  ;;  %v714_v60 = vor.u32 %v712_v43, %v711_v50  ;;  %v541_v61 = vmax.f32 %v523_v51, 0.0  ;;  %v772_v1 = vor.u32 %v771_v59, %v709_v45  ;;  %v730_v12 = vshrl.u32 %v2491_v34, 16  ;;  %1813 = vmatprep.subr.bf16.mxu1 %v1980_v48 }
 0x13e   : > { %v539_v10 = vmax.f32 %v515_v62, 0.0  ;;  %v707_v11 = vor.u32 %v705_v54, %v704_v63  ;;  %v770_v2 = vor.u32 %v769_v3, %v702_v53  ;;  %v697_v45 = vrot.slane %v695_v27, 7  ;;  %1814 = vmatpush3.bf16.msra.mxu1 %v1980_v48  ;;  %v1981_v54 = vld [vmem:[%s2957_s3 + $0x10] ss:$0 sps:$4 sm:$0x33]  }
 0x13f   : > { %v2526_v6 = vsel %vm2467_vm9, 0, %v714_v60  ;;  %v2528_v7 = vpack.c.bf16 %v541_v61, %v540_v56  ;;  %v2533_v40 = vsel %vm2441_vm5, %v772_v1, 0  ;;  %v2552_v20 = vor.u32 %v777_v14, %v730_v12  ;;  %1851 = vmatprep.subr.msk.bf16.mxu1 %vm1146_vm10, %v1981_v54 }
 0x140   : > { %836 = vrot.lane.b32.xlu1 %v793_v38, %s2160_s16  ;;  %v2540_v15 = vpack.c.bf16 %v539_v10, %v538_v57  ;;  %v2544_v16 = vsel %vm2467_vm9, 0, %v707_v11  ;;  %v2550_v19 = vsel %vm2441_vm5, %v770_v2, 0  ;;  %v700_v49 = vor.u32 %v698_v46, %v697_v45 }
 0x141   : > { %943 = vrot.lane.b32.xlu0 %v794_v39, %s2164_s21  ;;  %v723_v17 = vshrl.u32 %v2528_v7, 16  ;;  %v726_v18 = vshll.u32 %v2528_v7, 16  ;;  %v801_v28 = vsel %vm2441_vm5, %v2552_v20, 0  ;;  %v767_v50 = vrot.slane %v698_v46, 1 }
 0x142   : > { %v716_v23 = vshrl.u32 %v2540_v15, 16  ;;  %v719_v24 = vshll.u32 %v2540_v15, 16  ;;  %v2601_v51 = vsel %vm2467_vm9, 0, %v700_v49  ;;  %v732_v53 = vrot.slane %v730_v12, 7 }
 0x143   : > { %v725_v21 = vrot.slane %v723_v17, 7  ;;  %v775_v22 = vrot.slane %v726_v18, 1  ;;  %v768_v52 = vor.u32 %v767_v50, %v695_v27  ;;  %v691_v60 = vshll.u32 %v2460_v9, 16 }
 0x144   : > { %881 = vrot.lane.b32.xlu1 %v2458_v8, %s2157_s10  ;;  %v773_v31 = vrot.slane %v719_v24, 1  ;;  %v718_v32 = vrot.slane %v716_v23, 7  ;;  %v735_v57 = vor.u32 %v733_v55, %v732_v53 }
 0x145   : > { %838 = vrot.lane.b32.xlu0 %v794_v39, %s2160_s16  ;;  %v728_v29 = vor.u32 %v726_v18, %v725_v21  ;;  %v776_v30 = vor.u32 %v775_v22, %v723_v17  ;;  %v796_v56 = vsel %vm2441_vm5, %v768_v52, 0  ;;  %v765_v63 = vrot.slane %v691_v60, 1 }
 0x146   : > { %v774_v39 = vor.u32 %v773_v31, %v716_v23  ;;  %v721_v41 = vor.u32 %v719_v24, %v718_v32  ;;  %v758_v61 = vsel %vm2467_vm9, 0, %v735_v57 }
 0x147   : > { %v2570_v33 = vsel %vm2467_vm9, 0, %v728_v29  ;;  %v2574_v35 = vsel %vm2441_vm5, %v776_v30, 0 }
 0x148   : > { %818 = vrot.lane.b32.xlu1 %v2458_v8, %s2158_s15  ;;  %v2585_v43 = vsel %vm2441_vm5, %v774_v39, 0  ;;  %v2589_v47 = vsel %vm2467_vm9, 0, %v721_v41 }
 0x149   : > { %858 = vrot.lane.b32.xlu0 %v2558_v25, %s2161_s12 }
 0x14c   : > { %928 = vrot.lane.b32.xlu1 %v2460_v9, %s2159_s17 }
 0x14d   : > { %892 = vrot.lane.b32.xlu0 %v793_v38, %s2163_s22  ;;  %v688_v38 = vshrl.u32 %v2460_v9, 16 }
 0x14f   : > { %v690_v59 = vrot.slane %v688_v38, 7  ;;  %v766_v0 = vor.u32 %v765_v63, %v688_v38 }
 0x150   : > { %816 = vrot.lane.b32.xlu1 %v2460_v9, %s2158_s15 }
 0x151   : > { %930 = vrot.lane.b32.xlu0 %v2458_v8, %s2159_s17  ;;  %v1148_v8 = vsel %vm1146_vm10, %v1981_v54, 0  ;;  %v693_v62 = vor.u32 %v691_v60, %v690_v59 }
 0x152   : > { %1816 = vmatpush3.bf16.msra.mxu1 %v1148_v8 }
 0x153   : > { %v2626_v55 = vsel %vm2467_vm9, 0, %v693_v62 }
 0x154   : > { %864 = vrot.lane.b32.xlu1 %v2601_v51, %s2161_s12 }
 0x155   : > { %879 = vrot.lane.b32.xlu0 %v2460_v9, %s2157_s10  ;;  %v795_v9 = vsel %vm2441_vm5, %v766_v0, 0 }
 0x158   : > { %898 = vrot.lane.b32.xlu1 %v796_v56, %s2163_s22 }
 0x159   : > { %913 = vrot.lane.b32.xlu0 %v2601_v51, %s2162_s18 }
 0x15c   : > { %923 = vrot.lane.b32.xlu1 %v758_v61, %s2162_s18 }
 0x15d   : > { %947 = vrot.lane.b32.xlu0 %v796_v56, %s2164_s21 }
 0x160   : > { %911 = vrot.lane.b32.xlu1 %v2626_v55, %s2162_s18 }
 0x161   : > { %842 = vrot.lane.b32.xlu0 %v796_v56, %s2160_s16 }
 0x164   : > { %840 = vrot.lane.b32.xlu1 %v795_v9, %s2160_s16 }
 0x165   : > { %945 = vrot.lane.b32.xlu0 %v795_v9, %s2164_s21 }
 0x168   : > { %885 = vrot.lane.b32.xlu1 %v2493_v36, %s2157_s10 }
 0x169   : > { %862 = vrot.lane.b32.xlu0 %v2626_v55, %s2161_s12 }
 0x16c   : > { %822 = vrot.lane.b32.xlu1 %v2493_v36, %s2158_s15 }
 0x16d   : > { %896 = vrot.lane.b32.xlu0 %v795_v9, %s2163_s22 }
 0x170   : > { %932 = vrot.lane.b32.xlu1 %v2504_v44, %s2159_s17 }
 0x171   : > { %934 = vrot.lane.b32.xlu0 %v2493_v36, %s2159_s17 }
 0x174   : > { %820 = vrot.lane.b32.xlu1 %v2504_v44, %s2158_s15 }
 0x175   : > { %883 = vrot.lane.b32.xlu0 %v2504_v44, %s2157_s10 }
 0x178   : > { %868 = vrot.lane.b32.xlu1 %v2526_v6, %s2161_s12 }
 0x179   : > { %917 = vrot.lane.b32.xlu0 %v2526_v6, %s2162_s18 }
 0x17c   : > { %902 = vrot.lane.b32.xlu1 %v2533_v40, %s2163_s22 }
 0x17d   : > { %951 = vrot.lane.b32.xlu0 %v2533_v40, %s2164_s21 }
 0x180   : > { %915 = vrot.lane.b32.xlu1 %v2544_v16, %s2162_s18 }
 0x181   : > { %846 = vrot.lane.b32.xlu0 %v2533_v40, %s2160_s16 }
 0x184   : > { %844 = vrot.lane.b32.xlu1 %v2550_v19, %s2160_s16 }
 0x185   : > { %949 = vrot.lane.b32.xlu0 %v2550_v19, %s2164_s21 }
 0x188   : > { %889 = vrot.lane.b32.xlu1 %v2528_v7, %s2157_s10 }
 0x189   : > { %866 = vrot.lane.b32.xlu0 %v2544_v16, %s2161_s12 }
 0x18c   : > { %936 = vrot.lane.b32.xlu1 %v2540_v15, %s2159_s17 }
 0x18d   : > { %900 = vrot.lane.b32.xlu0 %v2550_v19, %s2163_s22 }
 0x190   : > { %824 = vrot.lane.b32.xlu1 %v2540_v15, %s2158_s15 }
 0x191   : > { %938 = vrot.lane.b32.xlu0 %v2528_v7, %s2159_s17 }
 0x194   : > { %872 = vrot.lane.b32.xlu1 %v2570_v33, %s2161_s12 }
 0x195   : > { %887 = vrot.lane.b32.xlu0 %v2540_v15, %s2157_s10  ;;  %s1722_s10 = sshll.u32 %s2138_s8, 5 }
 0x198   : > { %906 = vrot.lane.b32.xlu1 %v2574_v35, %s2163_s22 }
 0x199   : > { %921 = vrot.lane.b32.xlu0 %v2570_v33, %s2162_s18 }
 0x19b   : > { %v878_v36 = vpop.permute.xlu1 %877 }
 0x19c   : > { %919 = vrot.lane.b32.xlu1 %v2589_v47, %s2162_s18 }
 0x19d   : > { %953 = vrot.lane.b32.xlu0 %v2585_v43, %s2164_s21 }
 0x19f   : > { %v811_v44 = vpop.permute.xlu0 %810  ;;  %v815_v1 = vpop.permute.xlu1 %814 }
 0x1a0   : > { %848 = vrot.lane.b32.xlu1 %v2585_v43, %s2160_s16  ;;  %v962_v58 = vsel %vm959_vm11, %v749_v5, %v811_v44  ;;  %v968_v54 = vsel %vm959_vm11, %v2481_v26, %v815_v1 }
 0x1a1   : > { %870 = vrot.lane.b32.xlu0 %v2589_v47, %s2161_s12  ;;  %s2987_s12 = sld [smem:[#allocation12_spill]] }
 0x1a3   : > { %v927_v3 = vpop.permute.xlu0 %926 }
 0x1a4   : > { %940 = vrot.lane.b32.xlu1 %v2491_v34, %s2159_s17 }
 0x1a5   : > { %904 = vrot.lane.b32.xlu0 %v2585_v43, %s2163_s22 }
 0x1a6   : > { %v835_v10 = vpop.permute.xlu1 %834 }
 0x1a7   : > { %v813_v7 = vpop.permute.xlu0 %812  ;;  %v986_v18 = vsel %vm984_vm12, %v962_v58, %v835_v10 }
 0x1a8   : > { %957 = vrot.lane.b32.xlu1 %v801_v28, %s2164_s21  ;;  %v965_v32 = vsel %vm959_vm11, %v2558_v25, %v813_v7 }
 0x1a9   : > { %955 = vrot.lane.b32.xlu0 %v2574_v35, %s2164_s21  ;;  %s308_s21 = sand.u32 1, %s2114_s25  }
 0x1aa   : > { %v861_v12 = vpop.permute.xlu1 %860  ;;  %s1651_s7 = sshll.u32 %s308_s21, 6  ;;  %s2892_s22 = scalar_lea.sflag [#allocation4], %s308_s21 }
 0x1ab   : > { %v876_v11 = vpop.permute.xlu0 %875  ;;  %s2828_s19 = scalar_lea.vmem [#allocation5], %s1651_s7 }
 0x1ac   : > { %s1549_s30 = sshll.u32 %s2828_s19, 4  ;;  %s2877_s30 = int_to_ptr.vmem [resolvable:$true] %s1549_s30 }
 0x1ad   : > { %s2028_s7 = scalar_lea.vmem %s2877_s30, 1024 }
 0x1ae   : > { %v895_v2 = vpop.permute.xlu1 %894  ;;  %p2029_p0 = scmp.ne.s32.totalorder %s2877_s30, %s2028_s7 }
 0x1af   : > { %v910_v40 = vpop.permute.xlu0 %909 }
 0x1b0   : > { %p2030_p6 = pnand %p2029_p0, %p2988_p1 }
 0x1b2   : > { %v837_v15 = vpop.permute.xlu1 %836  ;;  %p2031_p9 = pneg %p2030_p6 }
 0x1b3   : > { %v944_v14 = vpop.permute.xlu0 %943  ;;  %v988_v33 = vsel %vm984_vm12, %v965_v32, %v837_v15 }
 0x1b4   : > { %v1005_v41 = vsel %vm1001_vm13, %v988_v33, %v861_v12 }
 0x1b5   : > { %v1021_v46 = vsel %vm404_vm1, %v1005_v41, %v878_v36 }
 0x1b6   : > { %v2705_v34 = vpop.permute.xlu1 %881  ;;  %v1038_v48 = vsel %vm1034_vm15, %v1021_v46, %v895_v2 }
 0x1b7   : > { %v839_v17 = vpop.permute.xlu0 %838 }
 0x1b8   : > { %v990_v8 = vsel %vm984_vm12, %v968_v54, %v839_v17 }
 0x1ba   : > { %v2713_v20 = vpop.permute.xlu1 %818 }
 0x1bb   : > { %v859_v19 = vpop.permute.xlu0 %858 }
 0x1bc   : > { %v1003_v21 = vsel %vm1001_vm13, %v986_v18, %v859_v19 }
 0x1bd   : > { %v1019_v23 = vsel %vm404_vm1, %v1003_v21, %v876_v11 }
 0x1be   : > { %v929_v24 = vpop.permute.xlu1 %928 }
 0x1bf   : > { %v893_v22 = vpop.permute.xlu0 %892 }
 0x1c0   : > { %v1036_v13 = vsel %vm1034_vm15, %v1019_v23, %v893_v22 }
 0x1c1   : > { %v1053_v37 = vsel %vm1051_vm14, %v1036_v13, %v910_v40 }
 0x1c2   : > { %v1070_v5 = vsel %vm1068_vm0, %v1053_v37, %v927_v3  ;;  %v817_v28 = vpop.permute.xlu1 %816 }
 0x1c3   : > { %v931_v27 = vpop.permute.xlu0 %930  ;;  %v1087_v29 = vsel %vm1085_vm2, %v1070_v5, %v944_v14  ;;  %v971_v7 = vsel %vm959_vm11, %v2626_v55, %v817_v28 }
 0x1c4   : > { %1817 = vmatprep.mubr.msk.bf16.mxu1 %vm1129_vm3, %v1087_v29 }
 0x1c6   : > { %v865_v31 = vpop.permute.xlu1 %864 }
 0x1c7   : > { %v880_v30 = vpop.permute.xlu0 %879 }
 0x1ca   : > { %v899_v39 = vpop.permute.xlu1 %898 }
 0x1cb   : > { %v914_v35 = vpop.permute.xlu0 %913 }
 0x1ce   : > { %v2726_v45 = vpop.permute.xlu1 %923 }
 0x1cf   : > { %v948_v42 = vpop.permute.xlu0 %947 }
 0x1d2   : > { %v912_v49 = vpop.permute.xlu1 %911 }
 0x1d3   : > { %v843_v43 = vpop.permute.xlu0 %842  ;;  %v1055_v50 = vsel %vm1051_vm14, %v1038_v48, %v912_v49 }
 0x1d4   : > { %v1072_v25 = vsel %vm1068_vm0, %v1055_v50, %v929_v24  ;;  %v974_v24 = vsel %vm959_vm11, %v2601_v51, %v2713_v20 }
 0x1d6   : > { %v841_v52 = vpop.permute.xlu1 %840 }
 0x1d7   : > { %v946_v38 = vpop.permute.xlu0 %945  ;;  %v992_v10 = vsel %vm984_vm12, %v971_v7, %v841_v52 }
 0x1d8   : > { %v1089_v53 = vsel %vm1085_vm2, %v1072_v25, %v946_v38  ;;  %v1009_v40 = vsel %vm1001_vm13, %v992_v10, %v865_v31 }
 0x1d9   : > { %1818 = vmatmul.mubr.msk.bf16.vlgmr.msra.gmra.mrb[8].mxu1 %vm1129_vm3, %v1089_v53  ;;  %v1025_v15 = vsel %vm404_vm1, %v1009_v40, %v2705_v34  ;;  %v994_v34 = vsel %vm984_vm12, %v974_v24, %v843_v43 }
 0x1da   : > { %v886_v57 = vpop.permute.xlu1 %885  ;;  %v1042_v58 = vsel %vm1034_vm15, %v1025_v15, %v899_v39 }
 0x1db   : > { %v863_v56 = vpop.permute.xlu0 %862 }
 0x1dc   : > { %v1007_v59 = vsel %vm1001_vm13, %v990_v8, %v863_v56 }
 0x1dd   : > { %v1023_v60 = vsel %vm404_vm1, %v1007_v59, %v880_v30 }
 0x1de   : > { %v823_v62 = vpop.permute.xlu1 %822 }
 0x1df   : > { %v897_v61 = vpop.permute.xlu0 %896 }
 0x1e0   : > { %v1040_v63 = vsel %vm1034_vm15, %v1023_v60, %v897_v61 }
 0x1e1   : > { %v1057_v0 = vsel %vm1051_vm14, %v1040_v63, %v914_v35 }
 0x1e2   : > { %v1074_v9 = vsel %vm1068_vm0, %v1057_v0, %v931_v27  ;;  %v933_v44 = vpop.permute.xlu1 %932 }
 0x1e3   : > { %v935_v36 = vpop.permute.xlu0 %934  ;;  %v1091_v26 = vsel %vm1085_vm2, %v1074_v9, %v948_v42 }
 0x1e4   : > { %1821 = vmatprep.mubr.msk.bf16.mxu1 %vm1129_vm3, %v1091_v26 }
 0x1e6   : > { %v821_v3 = vpop.permute.xlu1 %820 }
 0x1e7   : > { %v884_v1 = vpop.permute.xlu0 %883  ;;  %v977_v20 = vsel %vm959_vm11, %v2544_v16, %v821_v3  ;;  %v980_v16 = vsel %vm959_vm11, %v2526_v6, %v823_v62 }
 0x1ea   : > { %v869_v12 = vpop.permute.xlu1 %868 }
 0x1eb   : > { %v918_v11 = vpop.permute.xlu0 %917 }
 0x1ee   : > { %v903_v14 = vpop.permute.xlu1 %902 }
 0x1ef   : > { %v952_v2 = vpop.permute.xlu0 %951 }
 0x1f2   : > { %v916_v18 = vpop.permute.xlu1 %915 }
 0x1f3   : > { %v847_v17 = vpop.permute.xlu0 %846  ;;  %v1059_v19 = vsel %vm1051_vm14, %v1042_v58, %v916_v18 }
 0x1f4   : > { %v1076_v55 = vsel %vm1068_vm0, %v1059_v19, %v933_v44  ;;  %v998_v8 = vsel %vm984_vm12, %v980_v16, %v847_v17 }
 0x1f6   : > { %v845_v22 = vpop.permute.xlu1 %844 }
 0x1f7   : > { %v950_v21 = vpop.permute.xlu0 %949  ;;  %v996_v39 = vsel %vm984_vm12, %v977_v20, %v845_v22 }
 0x1f8   : > { %v1093_v23 = vsel %vm1085_vm2, %v1076_v55, %v950_v21  ;;  %v1013_v46 = vsel %vm1001_vm13, %v996_v39, %v869_v12 }
 0x1f9   : > { %1822 = vmatmul.mubr.msk.bf16.gmra.mrb[12].mxu1 %vm1129_vm3, %v1093_v23  ;;  %v1029_v49 = vsel %vm404_vm1, %v1013_v46, %v886_v57 }
 0x1fa   : > { %v890_v37 = vpop.permute.xlu1 %889  ;;  %v1046_v38 = vsel %vm1034_vm15, %v1029_v49, %v903_v14 }
 0x1fb   : > { %v867_v13 = vpop.permute.xlu0 %866 }
 0x1fc   : > { %v1011_v5 = vsel %vm1001_vm13, %v994_v34, %v867_v13 }
 0x1fd   : > { %v1027_v28 = vsel %vm404_vm1, %v1011_v5, %v884_v1 }
 0x1fe   : > { %v937_v29 = vpop.permute.xlu1 %936 }
 0x1ff   : > { %v901_v27 = vpop.permute.xlu0 %900 }
 0x200   : > { %v1044_v30 = vsel %vm1034_vm15, %v1027_v28, %v901_v27 }
 0x201   : > { %v1061_v31 = vsel %vm1051_vm14, %v1044_v30, %v918_v11 }
 0x202   : > { %v1078_v32 = vsel %vm1068_vm0, %v1061_v31, %v935_v36  ;;  %v825_v35 = vpop.permute.xlu1 %824 }
 0x203   : > { %v939_v33 = vpop.permute.xlu0 %938  ;;  %v1095_v51 = vsel %vm1085_vm2, %v1078_v32, %v952_v2  ;;  %v983_v56 = vsel %vm959_vm11, %v2589_v47, %v825_v35  ;;  %v1682_v2 = vld [vmem:[%s2958_s4] ss:$0 sm:$0xff] }
 0x204   : > { %1825 = vmatprep.mubr.msk.bf16.mxu1 %vm1129_vm3, %v1095_v51 }
 0x206   : > { %v873_v42 = vpop.permute.xlu1 %872 }
 0x207   : > { %v888_v41 = vpop.permute.xlu0 %887 }
 0x20a   : > { %v907_v48 = vpop.permute.xlu1 %906 }
 0x20b   : > { %v922_v43 = vpop.permute.xlu0 %921 }
 0x20e   : > { %v920_v25 = vpop.permute.xlu1 %919 }
 0x20f   : > { %v954_v50 = vpop.permute.xlu0 %953  ;;  %v1063_v52 = vsel %vm1051_vm14, %v1046_v38, %v920_v25 }
 0x210   : > { %v1080_v53 = vsel %vm1068_vm0, %v1063_v52, %v937_v29 }
 0x211   : > { %v1097_v54 = vsel %vm1085_vm2, %v1080_v53, %v954_v50 }
 0x212   : > { %1826 = vmatmul.mubr.msk.bf16.gmra.mrb[16].mxu1 %vm1129_vm3, %v1097_v54  ;;  %v849_v57 = vpop.permute.xlu1 %848 }
 0x213   : > { %v871_v59 = vpop.permute.xlu0 %870  ;;  %v1000_v61 = vsel %vm984_vm12, %v983_v56, %v849_v57 }
 0x214   : > { %v1015_v60 = vsel %vm1001_vm13, %v998_v8, %v871_v59  ;;  %v1017_v63 = vsel %vm1001_vm13, %v1000_v61, %v873_v42 }
 0x215   : > { %v1033_v0 = vsel %vm404_vm1, %v1017_v63, %v890_v37  ;;  %v1031_v62 = vsel %vm404_vm1, %v1015_v60, %v888_v41  ;;  %vm1515_vm1 = vcmask 125952  }
 0x216   : > { %v1050_v9 = vsel %vm1034_vm15, %v1033_v0, %v907_v48  ;;  %v941_v36 = vpop.permute.xlu1 %940 }
 0x217   : > { %v905_v6 = vpop.permute.xlu0 %904  ;;  %v1067_v44 = vsel %vm1051_vm14, %v1050_v9, %v2726_v45  ;;  %v1271_v45 = vld [vmem:[%s2959_s5] sm:$0x3] }
 0x218   : > { %v1048_v47 = vsel %vm1034_vm15, %v1031_v62, %v905_v6  ;;  %v1084_v3 = vsel %vm1068_vm0, %v1067_v44, %v941_v36  ;;  %1852 = vmatprep.subr.msk.bf16.mxu0 %vm1146_vm10, %v1271_v45  ;;  %v1304_v40 = vsel %vm1146_vm10, %v1271_v45, 0 }
 0x219   : > { %v1065_v26 = vsel %vm1051_vm14, %v1048_v47, %v922_v43  ;;  %1834 = vmatpush3.bf16.msra.mxu0 %v1304_v40 }
 0x21a   : > { %v1082_v1 = vsel %vm1068_vm0, %v1065_v26, %v939_v33  ;;  %v958_v10 = vpop.permute.xlu1 %957 }
 0x21b   : > { %v956_v7 = vpop.permute.xlu0 %955  ;;  %v1101_v12 = vsel %vm1085_vm2, %v1084_v3, %v958_v10  ;;  %v1405_v10 = vunpack.c.l.bf16 %v2376_v4 }
 0x21c   : > { %v1099_v11 = vsel %vm1085_vm2, %v1082_v1, %v956_v7  ;;  %v2816_v7 = vld [vmem:[%s2960_s6] ss:$0 sm:$0xff] }
 0x21d   : > { %1829 = vmatprep.mubr.msk.bf16.mxu1 %vm1129_vm3, %v1099_v11  ;;  %v1990_v11 = vld [vmem:[%s2367_s20] sm:$0xff]  }
 0x21e   : > { %1830 = vmatmul.mubr.msk.bf16.gmra.mrb[20].mxu1 %vm1129_vm3, %v1101_v12  ;;  %v1403_v12 = vunpack.c.l.bf16 %v1990_v11 }
 0x2ac   : > { %v1819_v14 = vpop.f32.mrb[8].mxu1 }
 0x2ad   : > { %v1193_v15 = vadd.f32 %v1819_v14, %v1682_v2  ;;  %v1184_v17 = vpop.f32.mrb[9].mxu1  ;;  %v1991_v14 = vld [vmem:[%s2367_s20 + $0x8] sm:$0xff]  }
 0x2ae   : > { %v1185_v58 = vadd.f32 %v1682_v2, %v1184_v17  ;;  %v1820_v18 = vpop.f32.mrb[10].mxu1  ;;  %v1404_v17 = vunpack.c.h.bf16 %v1990_v11 }
 0x2af   : > { %v1196_v19 = vadd.f32 %v1820_v18, %v1682_v2  ;;  %v1187_v21 = vpop.f32.mrb[11].mxu1  ;;  %v1249_v22 = vmax.f32 %v1193_v15, 0.0  ;;  %v1406_v15 = vunpack.c.h.bf16 %v1991_v14 }
 0x2b0   : > { %v1188_v55 = vadd.f32 %v1682_v2, %v1187_v21  ;;  %v1247_v24 = vmax.f32 %v1185_v58, 0.0 }
 0x2b1   : > { %v1250_v23 = vmax.f32 %v1196_v19, 0.0 }
 0x2b2   : > { %v1248_v34 = vmax.f32 %v1188_v55, 0.0 }
 0x2b3   : > { %v1264_v13 = vpack.c.bf16 %v1250_v23, %v1249_v22 }
 0x2b4   : > { %v1263_v37 = vpack.c.bf16 %v1248_v34, %v1247_v24 }
 0x2b6   : > { %1835 = vmatprep.mubr.msk.bf16.mxu0 %vm959_vm11, %v1263_v37 }
 0x2b7   : > { %1836 = vmatmul.mubr.msk.bf16.vlgmr.msra.gmra.mrb[16].mxu0 %vm959_vm11, %v1264_v13 }
 0x2cc   : > { %v1823_v5 = vpop.f32.mrb[12].mxu1 }
 0x2cd   : > { %v1209_v27 = vadd.f32 %v1823_v5, %v1682_v2  ;;  %v1200_v28 = vpop.f32.mrb[13].mxu1 }
 0x2ce   : > { %v1201_v29 = vadd.f32 %v1682_v2, %v1200_v28  ;;  %v1824_v30 = vpop.f32.mrb[14].mxu1 }
 0x2cf   : > { %v1212_v31 = vadd.f32 %v1824_v30, %v1682_v2  ;;  %v1203_v32 = vpop.f32.mrb[15].mxu1  ;;  %v1253_v35 = vmax.f32 %v1209_v27, 0.0 }
 0x2d0   : > { %v1204_v33 = vadd.f32 %v1682_v2, %v1203_v32  ;;  %v1251_v20 = vmax.f32 %v1201_v29, 0.0 }
 0x2d1   : > { %v1254_v51 = vmax.f32 %v1212_v31, 0.0  ;;  %v1992_v31 = vld [vmem:[%s2367_s20 + $0x18] sm:$0xff]  }
 0x2d2   : > { %v1252_v39 = vmax.f32 %v1204_v33, 0.0  ;;  %v1409_v32 = vunpack.c.l.bf16 %v1992_v31 }
 0x2d3   : > { %v1266_v41 = vpack.c.bf16 %v1254_v51, %v1253_v35  ;;  %v1993_v35 = vld [vmem:[%s2367_s20 + $0x10] sm:$0xff]  }
 0x2d4   : > { %v1265_v42 = vpack.c.bf16 %v1252_v39, %v1251_v20  ;;  %v1407_v51 = vunpack.c.l.bf16 %v1993_v35 }
 0x2d6   : > { %1839 = vmatprep.mubr.msk.bf16.mxu0 %vm959_vm11, %v1265_v42 }
 0x2d7   : > { %1840 = vmatmul.mubr.msk.bf16.gmra.mrb[20].mxu0 %vm959_vm11, %v1266_v41  ;;  %v1410_v41 = vunpack.c.h.bf16 %v1992_v31 }
 0x2e5   : > { %v1827_v46 = vpop.f32.mrb[16].mxu1 }
 0x2e6   : > { %v1225_v43 = vadd.f32 %v1827_v46, %v1682_v2  ;;  %v1216_v48 = vpop.f32.mrb[17].mxu1 }
 0x2e7   : > { %v1217_v49 = vadd.f32 %v1682_v2, %v1216_v48  ;;  %v1828_v50 = vpop.f32.mrb[18].mxu1 }
 0x2e8   : > { %v1228_v38 = vadd.f32 %v1828_v50, %v1682_v2  ;;  %v1219_v25 = vpop.f32.mrb[19].mxu1  ;;  %v1257_v53 = vmax.f32 %v1225_v43, 0.0  ;;  %v1408_v43 = vunpack.c.h.bf16 %v1993_v35 }
 0x2e9   : > { %v1220_v52 = vadd.f32 %v1682_v2, %v1219_v25  ;;  %v1255_v54 = vmax.f32 %v1217_v49, 0.0 }
 0x2ea   : > { %v1258_v16 = vmax.f32 %v1228_v38, 0.0 }
 0x2eb   : > { %v1256_v8 = vmax.f32 %v1220_v52, 0.0 }
 0x2ec   : > { %v1268_v56 = vpack.c.bf16 %v1258_v16, %v1257_v53 }
 0x2ed   : > { %v1267_v59 = vpack.c.bf16 %v1256_v8, %v1255_v54 }
 0x2ef   : > { %1843 = vmatprep.mubr.msk.bf16.mxu0 %vm959_vm11, %v1267_v59 }
 0x2f0   : > { %1844 = vmatmul.mubr.msk.bf16.gmra.mrb[24].mxu0 %vm959_vm11, %v1268_v56 }
 0x2f1   : > { %v1831_v57 = vpop.f32.mrb[20].mxu1 }
 0x2f2   : > { %v1241_v60 = vadd.f32 %v1831_v57, %v1682_v2  ;;  %v1232_v61 = vpop.f32.mrb[21].mxu1 }
 0x2f3   : > { %v1233_v63 = vadd.f32 %v1682_v2, %v1232_v61  ;;  %v1832_v0 = vpop.f32.mrb[22].mxu1 }
 0x2f4   : > { %v1244_v6 = vadd.f32 %v1832_v0, %v1682_v2  ;;  %v1235_v62 = vpop.f32.mrb[23].mxu1  ;;  %v1261_v36 = vmax.f32 %v1241_v60, 0.0 }
 0x2f5   : > { %v1236_v9 = vadd.f32 %v1682_v2, %v1235_v62  ;;  %v1259_v44 = vmax.f32 %v1233_v63, 0.0  ;;  %v1994_v63 = vld [vmem:[%s2367_s20 + $0x28] sm:$0xff]   ;;  %v1995_v62 = vld [vmem:[%s2367_s20 + $0x20] sm:$0xff]  }
 0x2f6   : > { %v1262_v47 = vmax.f32 %v1244_v6, 0.0  ;;  %v1413_v0 = vunpack.c.l.bf16 %v1994_v63 }
 0x2f7   : > { %v1260_v26 = vmax.f32 %v1236_v9, 0.0  ;;  %v1411_v9 = vunpack.c.l.bf16 %v1995_v62 }
 0x2f8   : > { %v1270_v1 = vpack.c.bf16 %v1262_v47, %v1261_v36 }
 0x2f9   : > { %v1269_v3 = vpack.c.bf16 %v1260_v26, %v1259_v44  ;;  %v1414_v44 = vunpack.c.h.bf16 %v1994_v63 }
 0x2fb   : > { %1847 = vmatprep.mubr.msk.bf16.mxu0 %vm959_vm11, %v1269_v3  ;;  %v1412_v3 = vunpack.c.h.bf16 %v1995_v62 }
 0x2fc   : > { %1848 = vmatmul.mubr.msk.bf16.gmra.mrb[28].mxu0 %vm959_vm11, %v1270_v1 }
 0x38a   : > { %v1837_v45 = vpop.f32.mrb[16].mxu0 }
 0x38b   : > { %v1349_v40 = vadd.f32 %v1837_v45, %v2816_v7  ;;  %v1340_v2 = vpop.f32.mrb[17].mxu0 }
 0x38c   : > { %v1341_v58 = vadd.f32 %v2816_v7, %v1340_v2  ;;  %v1838_v18 = vpop.f32.mrb[18].mxu0 }
 0x38d   : > { %v1421_v19 = vadd.f32 %v1405_v10, %v1349_v40  ;;  %v1352_v21 = vadd.f32 %v1838_v18, %v2816_v7  ;;  %v1343_v55 = vpop.f32.mrb[19].mxu0 }
 0x38e   : > { %v1419_v4 = vadd.f32 %v1403_v12, %v1341_v58  ;;  %v1344_v22 = vadd.f32 %v2816_v7, %v1343_v55 }
 0x38f   : > { %v1437_v23 = vmax.f32 %v1421_v19, 0.0  ;;  %v1422_v24 = vadd.f32 %v1406_v15, %v1352_v21 }
 0x390   : > { %v1435_v34 = vmax.f32 %v1419_v4, 0.0  ;;  %v1420_v13 = vadd.f32 %v1404_v17, %v1344_v22  ;;  %v1996_v22 = vld [vmem:[%s2367_s20 + $0x38] sm:$0xff]  }
 0x391   : > { %v1733_v37 = vpack.c.bf16 %v1437_v23, %v1437_v23  ;;  %v1438_v5 = vmax.f32 %v1422_v24, 0.0  ;;  %v1417_v23 = vunpack.c.l.bf16 %v1996_v22 }
 0x392   : > { %v1731_v27 = vpack.c.bf16 %v1435_v34, %v1435_v34  ;;  %v1436_v28 = vmax.f32 %v1420_v13, 0.0  ;;  %v1997_v34 = vld [vmem:[%s2367_s20 + $0x30] sm:$0xff]   ;;  %s1546_s20 = sadd.s32 %s1747_s13, %s1722_s10  ;;  %s2165_s13 = smov [#allocation5]  }
 0x393   : > { %1518 = vst.msk [vmem:[%s2828_s19 + $0x8] sm:$0xf] %vm1515_vm1, %v1733_v37  ;;  %v1734_v29 = vpack.c.bf16 %v1438_v5, %v1438_v5  ;;  %v1415_v13 = vunpack.c.l.bf16 %v1997_v34  ;;  %s1723_s8 = sshll.u32 %s1546_s20, 6  ;;  %s2032_s10 = sshll.u32 %s2165_s13, 4  ;;  %s2033_s10 = int_to_ptr.vmem [resolvable:$false] %s2032_s10 }
 0x394   : > { %1516 = vst.msk [vmem:[%s2828_s19] sm:$0xf] %vm1515_vm1, %v1731_v27  ;;  %v1732_v30 = vpack.c.bf16 %v1436_v28, %v1436_v28  ;;  %v1418_v27 = vunpack.c.h.bf16 %v1996_v22  ;;  %s2884_s18 = scalar_lea.hbm %s2987_s12, %s1723_s8  ;;  %s2034_s20 = scalar_lea.vmem %s2033_s10, 2048 }
 0x395   : > { %1519 = vst.msk [vmem:[%s2828_s19 + $0xc] sm:$0xf] %vm1515_vm1, %v1734_v29  ;;  %p2035_p3 = scmp.lt.s32.totalorder %s2877_s30, %s2033_s10  ;;  %p2036_p11 = scmp.lt.s32.totalorder %s2034_s20, %s2028_s7 }
 0x396   : > { %1517 = vst.msk [vmem:[%s2828_s19 + $0x4] sm:$0xf] %vm1515_vm1, %v1732_v30  ;;  %v1416_v30 = vunpack.c.h.bf16 %v1997_v34 }
 0x397   : > { %p2037_p13 = por %p2036_p11, %p2035_p3 }
 0x399   : > { %p2038_p5 = pnand %p2037_p13, %p2031_p9 }
 0x3aa   : > { %v1841_v33 = vpop.f32.mrb[20].mxu0 }
 0x3ab   : > { %v1365_v20 = vadd.f32 %v1841_v33, %v2816_v7  ;;  %v1356_v39 = vpop.f32.mrb[21].mxu0 }
 0x3ac   : > { %v1357_v42 = vadd.f32 %v2816_v7, %v1356_v39  ;;  %v1842_v46 = vpop.f32.mrb[22].mxu0 }
 0x3ad   : > { %v1425_v48 = vadd.f32 %v1409_v32, %v1365_v20  ;;  %v1368_v49 = vadd.f32 %v1842_v46, %v2816_v7  ;;  %v1359_v50 = vpop.f32.mrb[23].mxu0 }
 0x3ae   : > { %v1423_v38 = vadd.f32 %v1407_v51, %v1357_v42  ;;  %v1360_v25 = vadd.f32 %v2816_v7, %v1359_v50 }
 0x3af   : > { %v1441_v52 = vmax.f32 %v1425_v48, 0.0  ;;  %v1426_v53 = vadd.f32 %v1410_v41, %v1368_v49 }
 0x3b0   : > { %v1439_v16 = vmax.f32 %v1423_v38, 0.0  ;;  %v1424_v54 = vadd.f32 %v1408_v43, %v1360_v25 }
 0x3b1   : > { %v1737_v8 = vpack.c.bf16 %v1441_v52, %v1441_v52  ;;  %v1442_v56 = vmax.f32 %v1426_v53, 0.0 }
 0x3b2   : > { %v1735_v59 = vpack.c.bf16 %v1439_v16, %v1439_v16  ;;  %v1440_v57 = vmax.f32 %v1424_v54, 0.0 }
 0x3b3   : > { %1522 = vst.msk [vmem:[%s2828_s19 + $0x18] sm:$0xf] %vm1515_vm1, %v1737_v8  ;;  %v1738_v60 = vpack.c.bf16 %v1442_v56, %v1442_v56 }
 0x3b4   : > { %1520 = vst.msk [vmem:[%s2828_s19 + $0x10] sm:$0xf] %vm1515_vm1, %v1735_v59  ;;  %v1736_v61 = vpack.c.bf16 %v1440_v57, %v1440_v57 }
 0x3b5   : > { %1523 = vst.msk [vmem:[%s2828_s19 + $0x1c] sm:$0xf] %vm1515_vm1, %v1738_v60 }
 0x3b6   : > { %1521 = vst.msk [vmem:[%s2828_s19 + $0x14] sm:$0xf] %vm1515_vm1, %v1736_v61 }
 0x3c3   : > { %v1845_v6 = vpop.f32.mrb[24].mxu0 }
 0x3c4   : > { %v1381_v36 = vadd.f32 %v1845_v6, %v2816_v7  ;;  %v1372_v47 = vpop.f32.mrb[25].mxu0 }
 0x3c5   : > { %v1373_v26 = vadd.f32 %v2816_v7, %v1372_v47  ;;  %v1846_v1 = vpop.f32.mrb[26].mxu0 }
 0x3c6   : > { %v1429_v10 = vadd.f32 %v1413_v0, %v1381_v36  ;;  %v1384_v11 = vadd.f32 %v1846_v1, %v2816_v7  ;;  %v1375_v12 = vpop.f32.mrb[27].mxu0 }
 0x3c7   : > { %v1427_v45 = vadd.f32 %v1411_v9, %v1373_v26  ;;  %v1376_v40 = vadd.f32 %v2816_v7, %v1375_v12 }
 0x3c8   : > { %v1445_v2 = vmax.f32 %v1429_v10, 0.0  ;;  %v1430_v14 = vadd.f32 %v1414_v44, %v1384_v11 }
 0x3c9   : > { %v1443_v15 = vmax.f32 %v1427_v45, 0.0  ;;  %v1428_v17 = vadd.f32 %v1412_v3, %v1376_v40 }
 0x3ca   : > { %v1741_v58 = vpack.c.bf16 %v1445_v2, %v1445_v2  ;;  %v1446_v18 = vmax.f32 %v1430_v14, 0.0 }
 0x3cb   : > { %v1739_v19 = vpack.c.bf16 %v1443_v15, %v1443_v15  ;;  %v1444_v21 = vmax.f32 %v1428_v17, 0.0 }
 0x3cc   : > { %1526 = vst.msk [vmem:[%s2828_s19 + $0x28] sm:$0xf] %vm1515_vm1, %v1741_v58  ;;  %v1742_v55 = vpack.c.bf16 %v1446_v18, %v1446_v18 }
 0x3cd   : > { %1524 = vst.msk [vmem:[%s2828_s19 + $0x20] sm:$0xf] %vm1515_vm1, %v1739_v19  ;;  %v1740_v4 = vpack.c.bf16 %v1444_v21, %v1444_v21 }
 0x3ce   : > { %1527 = vst.msk [vmem:[%s2828_s19 + $0x2c] sm:$0xf] %vm1515_vm1, %v1742_v55 }
 0x3cf   : > { %v1849_v24 = vpop.f32.mrb[28].mxu0  ;;  %1525 = vst.msk [vmem:[%s2828_s19 + $0x24] sm:$0xf] %vm1515_vm1, %v1740_v4 }
 0x3d0   : > { %v1397_v37 = vadd.f32 %v1849_v24, %v2816_v7  ;;  %v1388_v5 = vpop.f32.mrb[29].mxu0 }
 0x3d1   : > { %v1389_v28 = vadd.f32 %v2816_v7, %v1388_v5  ;;  %v1850_v29 = vpop.f32.mrb[30].mxu0 }
 0x3d2   : > { %v1433_v31 = vadd.f32 %v1417_v23, %v1397_v37  ;;  %v1400_v32 = vadd.f32 %v1850_v29, %v2816_v7  ;;  %v1391_v33 = vpop.f32.mrb[31].mxu0 }
 0x3d3   : > { %v1431_v35 = vadd.f32 %v1415_v13, %v1389_v28  ;;  %v1392_v51 = vadd.f32 %v2816_v7, %v1391_v33 }
 0x3d4   : > { %v1449_v20 = vmax.f32 %v1433_v31, 0.0  ;;  %v1434_v39 = vadd.f32 %v1418_v27, %v1400_v32 }
 0x3d5   : > { %v1447_v41 = vmax.f32 %v1431_v35, 0.0  ;;  %v1432_v42 = vadd.f32 %v1416_v30, %v1392_v51 }
 0x3d6   : > { %v1745_v46 = vpack.c.bf16 %v1449_v20, %v1449_v20  ;;  %v1450_v43 = vmax.f32 %v1434_v39, 0.0 }
 0x3d7   : > { %v1743_v48 = vpack.c.bf16 %v1447_v41, %v1447_v41  ;;  %v1448_v49 = vmax.f32 %v1432_v42, 0.0 }
 0x3d8   : > { %1530 = vst.msk [vmem:[%s2828_s19 + $0x38] sm:$0xf] %vm1515_vm1, %v1745_v46  ;;  %v1746_v50 = vpack.c.bf16 %v1450_v43, %v1450_v43 }
 0x3d9   : > { %1528 = vst.msk [vmem:[%s2828_s19 + $0x30] sm:$0xf] %vm1515_vm1, %v1743_v48  ;;  %v1744_v7 = vpack.c.bf16 %v1448_v49, %v1448_v49 }
 0x3da   : > { %1531 = vst.msk [vmem:[%s2828_s19 + $0x3c] sm:$0xf] %vm1515_vm1, %v1746_v50 }
 0x3db   : > { %1529 = vst.msk [vmem:[%s2828_s19 + $0x34] sm:$0xf] %vm1515_vm1, %v1744_v7 }
 0x3dc   : > { %2041 = shalt.err (!%p2038_p5)
}
 0x3dd   : > { %s2042_s21 = scalar_lea.hbm %s2884_s18, 1024  ;;  %s2046_s17 = scalar_lea.hbm %s2987_s12, 4096 }
 0x3de   : > { %p2043_p8 = scmp.ne.s32.totalorder %s2884_s18, %s2042_s21  ;;  %p2047_p7 = scmp.lt.u32.totalorder %s2884_s18, %s2987_s12 }
 0x3df   : > { %p2048_p2 = scmp.lt.u32.totalorder %s2046_s17, %s2042_s21  ;;  %p2050_p0 = scmp.lt.u32.totalorder %s2042_s21, %s2884_s18 }
 0x3e0   : > { %p2044_p10 = pnand %p2043_p8, %p2988_p1 }
 0x3e1   : > { %p2049_p4 = por %p2048_p2, %p2047_p7 }
 0x3e2   : > { %p2045_p12 = pneg %p2044_p10 }
 0x3e3   : > { %p2051_p6 = por %p2050_p0, %p2049_p4 }
 0x3e5   : > { %p2052_p9 = pnand %p2051_p6, %p2045_p12 }
 0x3e7   : > { %2055 = shalt.err (!%p2052_p9)
}
 0x3e8   : > { %s2166_s7 = smov 64  }
 0x3e9   : > { %1855 = dma.vmem_to_hbm [thread:$0]  (%p2988_p1), %s2877_s30, 1024, %s2884_s18, %s2892_s22, %s2166_s7, %s2166_s7, %s2158_s15  }
 0x3ea PF: > { %p1866_p3 = scmp.ge.s32.totalorder %s2150_s11, 2  ;;  %s1564_s10 = sand.u32 1, %s2110_s24  }
 0x3eb   : > { %p2989_p11 = scmp.ne.s32.totalorder %s2976_s9, 0  ;;  %s1565_s20 = scalar_lea.sflag [#allocation4], %s1564_s10 }
 0x3ed   : > { %p1862_p13 = pnand %p1866_p3, %p2989_p11 }
 0x3ef   : > { %2105 = dma.done.wait (!%p1862_p13), %s1565_s20, 1024  }
 0x3f0   : > { %2107 = vsyncadd (!%p1862_p13), %s1565_s20, 4294966272  ;;  %s23_s11 = sadd.s32 1, %s2150_s11   ;;  %s2990_s23 = smov %s2294_s27 }
 0x3f1   : > { %p20_p5 = scmp.ge.s32.totalorder %s23_s11, 6   ;;  %s2991_s30 = sld [smem:[#allocation8_spill]] }
 0x3f2   : > { %s2992_s8 = sld [smem:[#allocation9_spill]]  ;;  %s2993_s9 = sld [smem:[#allocation10_spill]] }
 0x3f3   : > { %s2994_s10 = sld [smem:[#allocation11_spill]]  ;;  %s2995_s24 = smov %s2114_s25 }
 0x3f4   : > { %s2996_s25 = smov %s2118_s26  ;;  %s2997_s26 = smov %s2297_s14 }
 0x3f5   : > { %s2998_s27 = smov %s2126_s28  ;;  %s2999_s28 = smov %s2130_s29 }
 0x3f6   : > { %s3000_s29 = smov %s2990_s23  ;;  %22 = sbr.rel (!%p20_p5) target bundleno = 11 (0xb), region = 96 }
 0x3fd   :  { %1570 = vsyncpa [#allocation3], 1 }
 0x3fe   :  { %1572 = vsyncpa [#allocation3 + $0x1], 1 }
 0x3ff   :  { %1573 = vsyncpa [#allocation4], 1 }
 0x400   :  { %1575 = vsyncpa [#allocation4 + $0x1], 1 }

</bundles_post_ra>
